<compile_context>
chip_gen: v6e
topology: v6e:2x2x1
jax: 0.10.0
libtpu: 0.0.40
codegen_flags: <defaults>
</compile_context>

<pallas_src>
import jax
import jax.numpy as jnp
import numpy as np
from jax.experimental import pallas as pl
from jax.experimental.pallas import tpu as pltpu

C_IN, L_IN = 16, 49
C0, K0 = 63, 44
L0 = L_IN - K0 + 1          # 6
C1, K1 = 56, 6
L1 = L0 - K1 + 1            # 1
C2 = 10
D_IN = C_IN * L_IN          # 784 (flattened input features)
C_PAD = 128                 # lane-dense padded class dim

_PREC = jax.lax.Precision.HIGHEST
_NEG_BIG = -1e30            # bias for padded classes -> exp underflows to exactly 0


def _round_up(n, m):
    return (n + m - 1) // m * m


def _conv1donly6_kernel(x_ref, w_ref, b_ref, out_ref):
    """One batch tile.

    x_ref  : (TB, 784)  flattened input rows (channel-major, position-minor)
    w_ref  : (784, 128) composed conv0*conv1*conv2 weight, zero-padded cols 10..127
    b_ref  : (1, 128)   composed bias; padded cols hold -1e30
    out_ref: (TB, 128)  log-probabilities in cols 0..9 (cols 10..127 are junk)
    """
    h = jnp.dot(x_ref[...], w_ref[...],
                preferred_element_type=jnp.float32, precision=_PREC)
    h = h + b_ref[...]

    # LogSoftmax over the class dim. Padded columns sit at ~-1e30, so they never
    # win the max and exp() underflows to 0 -> the sum covers exactly the 10 classes.
    m = jnp.max(h, axis=-1, keepdims=True)
    s = h - m
    lse = jnp.log(jnp.sum(jnp.exp(s), axis=-1, keepdims=True))
    out_ref[...] = (s - lse).astype(out_ref.dtype)


def _compose_effective_weights(params):
    """Fold conv0 -> conv1 -> conv2 into a single (784, 10) weight and (10,) bias.

    Valid because there is no nonlinearity between the convs. All composition is
    done in f32 at HIGHEST precision so rounding stays far below the 1e-3 tolerance.
    """
    w0, b0, w1, b1, w2, b2 = params          # torch layouts: (O, I, K), (O,)
    w0 = w0.astype(jnp.float32)
    w1 = w1.astype(jnp.float32)
    w2 = w2.astype(jnp.float32)
    b0 = b0.astype(jnp.float32)
    b1 = b1.astype(jnp.float32)
    b2 = b2.astype(jnp.float32)

    w2m = w2[:, :, 0]                                         # (10, 56)

    # w12[o2, c0, l0] = sum_c1 w2[o2, c1] * w1[c1, c0, l0]     -> (10, 63, 6)
    w12 = jnp.einsum('ab,bcl->acl', w2m, w1, precision=_PREC)

    # W_full[o2, i, m] = sum_{l0, c0} w12[o2, c0, l0] * w0[c0, i, m - l0]
    w_full = jnp.zeros((C2, C_IN, L_IN), dtype=jnp.float32)
    for l0 in range(L0):
        contrib = jnp.einsum('oc,cik->oik', w12[:, :, l0], w0,
                             precision=_PREC)                 # (10, 16, 44)
        w_full = w_full.at[:, :, l0:l0 + K0].add(contrib)

    # b_eff = b2 + w2 @ b1 + sum_{c0,l0} w12[:, c0, l0] * b0[c0]
    b_eff = (b2
             + jnp.einsum('ab,b->a', w2m, b1, precision=_PREC)
             + jnp.einsum('ocl,c->o', w12, b0, precision=_PREC))

    w_mat = w_full.reshape(C2, D_IN).T                        # (784, 10)

    # Lane-dense padding of the class dim.
    w_pad = jnp.zeros((D_IN, C_PAD), dtype=jnp.float32).at[:, :C2].set(w_mat)
    b_pad = jnp.full((1, C_PAD), _NEG_BIG, dtype=jnp.float32).at[0, :C2].set(b_eff)
    return w_pad, b_pad


def conv1donly_6_forward(x, params):
    """x: (B, 16, 7, 7) float32 (anything that views to (B, 16, 49))."""
    B = x.shape[0]

    # Batch tile: multiple of 8 sublanes, big enough to amortize per-step overhead.
    TB = min(256, _round_up(max(B, 1), 8))
    B_pad = _round_up(B, TB)
    grid = B_pad // TB

    # Flatten to (B, 784): channel-major, position-minor -- matches x.view(B,16,49).
    x_flat = x.reshape(B, D_IN).astype(jnp.float32)
    if B_pad != B:
        x_flat = jnp.pad(x_flat, ((0, B_pad - B), (0, 0)))

    w_pad, b_pad = _compose_effective_weights(params)

    out = pl.pallas_call(
        _conv1donly6_kernel,
        out_shape=jax.ShapeDtypeStruct((B_pad, C_PAD), jnp.float32),
        grid_spec=pltpu.PrefetchScalarGridSpec(
            num_scalar_prefetch=0,
            grid=(grid,),
            in_specs=[
                pl.BlockSpec((TB, D_IN), lambda i: (i, 0)),     # x tile (batch tiled)
                pl.BlockSpec((D_IN, C_PAD), lambda i: (0, 0)),  # W_eff (VMEM-resident)
                pl.BlockSpec((1, C_PAD), lambda i: (0, 0)),     # b_eff
            ],
            out_specs=pl.BlockSpec((TB, C_PAD), lambda i: (i, 0)),
        ),
        compiler_params=pltpu.CompilerParams(
            dimension_semantics=("parallel",)),
    )(x_flat, w_pad, b_pad)

    return out[:B, :C2]


def _reference_forward(x, params):
    """Pure-JAX reference mimicking the PyTorch module exactly (HIGHEST precision)."""
    w0, b0, w1, b1, w2, b2 = params
    B = x.shape[0]
    y = x.reshape(B, C_IN, L_IN)

    def conv1d(inp, w, b):
        out = jax.lax.conv_general_dilated(
            inp, w, window_strides=(1,), padding="VALID",
            dimension_numbers=("NCH", "OIH", "NCH"),
            precision=jax.lax.Precision.HIGHEST)
        return out + b[None, :, None]

    y = conv1d(y, w0, b0)
    y = conv1d(y, w1, b1)
    y = conv1d(y, w2, b2)
    y = y.reshape(B, C2)
    return jax.nn.log_softmax(y, axis=1)


def _init_params(key):
    """Deterministic param init (torch-like uniform(-1/sqrt(fan_in), 1/sqrt(fan_in)))."""
    ks = jax.random.split(key, 6)

    def u(k, shape, fan_in):
        bound = 1.0 / np.sqrt(fan_in)
        return jax.random.uniform(k, shape, jnp.float32, -bound, bound)

    w0 = u(ks[0], (C0, C_IN, K0), C_IN * K0)
    b0 = u(ks[1], (C0,), C_IN * K0)
    w1 = u(ks[2], (C1, C0, K1), C0 * K1)
    b1 = u(ks[3], (C1,), C0 * K1)
    w2 = u(ks[4], (C2, C1, 1), C1 * 1)
    b2 = u(ks[5], (C2,), C1 * 1)
    return (w0, b0, w1, b1, w2, b2)


if __name__ == "__main__":
    key = jax.random.PRNGKey(0)
    k_x, k_p = jax.random.split(key)

    B = 2
    x = jax.random.normal(k_x, (B, 16, 7, 7), dtype=jnp.float32)  # views to (B,16,49)
    params = _init_params(k_p)

    out = conv1donly_6_forward(x, params)
    out = jax.block_until_ready(out)

    ref = jax.block_until_ready(_reference_forward(x, params))
    np.testing.assert_allclose(np.asarray(out), np.asarray(ref), atol=1e-3, rtol=1e-3)
    assert out.shape == (B, 10)

    print("KERNEL_OK")
</pallas_src>

<mosaic_0001>
module attributes {stable_mosaic.version = 11 : i64} {
  func.func @_conv1donly6_kernel(%arg0: i32, %arg1: memref<8x784xf32, #tpu.memory_space<vmem>>, %arg2: memref<784x128xf32, #tpu.memory_space<vmem>>, %arg3: memref<1x128xf32, #tpu.memory_space<vmem>>, %arg4: memref<8x128xf32, #tpu.memory_space<vmem>>) attributes {dimension_semantics = [#tpu.dimension_semantics<parallel>], iteration_bounds = array<i64: 1>, scalar_prefetch = 0 : i64, scratch_operands = 0 : i64, tpu.core_type = #tpu.core_type<tc>, window_params = [{transform_indices = @transform_0, window_bounds = array<i64: 8, 784>}, {pipeline_mode = #tpu.pipeline_mode<synchronous>, transform_indices = @transform_1, window_bounds = array<i64: 784, 128>}, {pipeline_mode = #tpu.pipeline_mode<synchronous>, transform_indices = @transform_2, window_bounds = array<i64: 1, 128>}, {transform_indices = @transform_3, window_bounds = array<i64: 8, 128>}]} {
    %c0 = arith.constant 0 : index
    %c0_0 = arith.constant 0 : index
    %0 = vector.load %arg1[%c0, %c0_0] : memref<8x784xf32, #tpu.memory_space<vmem>>, vector<8x784xf32>
    %c0_1 = arith.constant 0 : index
    %c0_2 = arith.constant 0 : index
    %1 = vector.load %arg2[%c0_1, %c0_2] : memref<784x128xf32, #tpu.memory_space<vmem>>, vector<784x128xf32>
    %cst = arith.constant dense<0.000000e+00> : vector<8x128xf32>
    %2 = tpu.matmul %0, %1, %cst {dimension_numbers = #tpu.dot_dimension_numbers<[1], [0], [0], [1], [0, 0, 1, 1], [], []>, precision = #tpu.contract_precision<fp32>} : vector<8x784xf32>, vector<784x128xf32>, vector<8x128xf32> -> vector<8x128xf32>
    %c0_3 = arith.constant 0 : index
    %c0_4 = arith.constant 0 : index
    %3 = vector.load %arg3[%c0_3, %c0_4] : memref<1x128xf32, #tpu.memory_space<vmem>>, vector<1x128xf32>
    %4 = vector.broadcast %3 : vector<1x128xf32> to vector<8x128xf32>
    %5 = arith.addf %2, %4 : vector<8x128xf32>
    %cst_5 = arith.constant dense<0xFF800000> : vector<8xf32>
    %6 = vector.multi_reduction <maximumf>, %5, %cst_5 [1] : vector<8x128xf32> to vector<8xf32>
    %7 = vector.shape_cast %6 : vector<8xf32> to vector<8x1xf32>
    %8 = vector.broadcast %7 : vector<8x1xf32> to vector<8x128xf32>
    %9 = arith.subf %5, %8 : vector<8x128xf32>
    %10 = math.exp %9 : vector<8x128xf32>
    %cst_6 = arith.constant dense<0.000000e+00> : vector<8xf32>
    %11 = vector.multi_reduction <add>, %10, %cst_6 [1] : vector<8x128xf32> to vector<8xf32>
    %12 = vector.shape_cast %11 : vector<8xf32> to vector<8x1xf32>
    %13 = math.log %12 : vector<8x1xf32>
    %14 = vector.broadcast %13 : vector<8x1xf32> to vector<8x128xf32>
    %15 = arith.subf %9, %14 : vector<8x128xf32>
    %c0_7 = arith.constant 0 : index
    %c0_8 = arith.constant 0 : index
    %16 = vector.load %arg4[%c0_7, %c0_8] : memref<8x128xf32, #tpu.memory_space<vmem>>, vector<8x128xf32>
    tpu.vector_store %arg4[%c0_7, %c0_8], %15 {strides = array<i32>} : memref<8x128xf32, #tpu.memory_space<vmem>>, vector<8x128xf32>,
    return
  }
  func.func @transform_0(%arg0: i32) -> (i32, i32) {
    %c0_i32 = arith.constant 0 : i32
    %c0_i32_0 = arith.constant 0 : i32
    return %arg0, %c0_i32 : i32, i32
  }
  func.func @transform_1(%arg0: i32) -> (i32, i32) {
    %c0_i32 = arith.constant 0 : i32
    %c0_i32_0 = arith.constant 0 : i32
    %c0_i32_1 = arith.constant 0 : i32
    return %c0_i32, %c0_i32_0 : i32, i32
  }
  func.func @transform_2(%arg0: i32) -> (i32, i32) {
    %c0_i32 = arith.constant 0 : i32
    %c0_i32_0 = arith.constant 0 : i32
    %c0_i32_1 = arith.constant 0 : i32
    return %c0_i32, %c0_i32_0 : i32, i32
  }
  func.func @transform_3(%arg0: i32) -> (i32, i32) {
    %c0_i32 = arith.constant 0 : i32
    %c0_i32_0 = arith.constant 0 : i32
    return %arg0, %c0_i32 : i32, i32
  }
}

</mosaic_0001>

<bundles_post_ra>
// kernel: tpu_custom_call.1
= control target key start
LH: loop header
LB: loop body
LE: loop exit
PB: predicated region body
PF: predicated region fallthrough
CT: control target
= control target key end

     0   :  { %8 = vsyncpa [#allocation3], 0  ;;  %s5819_s0 = inlined_call_operand.hbm [shape: f32[8,784], index: 0, kind: input, shape index: {}]   ;;  %s5820_s1 = inlined_call_operand.hbm [shape: f32[784,128], index: 1, kind: input, shape index: {}]   ;;  %s5821_s2 = inlined_call_operand.vmem [shape: f32[1,128], index: 2, kind: input, shape index: {}]   ;;  %s5822_s3 = inlined_call_operand.hbm [shape: f32[8,128], index: 3, kind: output, shape index: {}]  }
   0x1   :  { %9 = vsyncpa [#allocation6], 0 }
   0x2   :  { %10 = vsyncpa [#allocation4], 0  ;;  %s3997_s12 = smov [#allocation2]   ;;  %s3998_s14 = smov [#allocation5]  }
   0x3   :  { %s17_s13 = sshll.u32 %s3997_s12, 4  ;;  %s26_s15 = sshll.u32 %s3998_s14, 4  ;;  %s18_s13 = int_to_ptr.vmem [resolvable:$true] %s17_s13  ;;  %s27_s15 = int_to_ptr.vmem [resolvable:$true] %s26_s15 }
   0x4   :  { %s3939_s16 = scalar_lea.vmem %s18_s13, 896  ;;  %p3944_p1 = scmp.lt.s32.totalorder %s18_s13, %s18_s13 }
   0x5   :  { %p3940_p0 = scmp.ne.s32.totalorder %s18_s13, %s3939_s16  ;;  %p3945_p2 = scmp.lt.s32.totalorder %s3939_s16, %s3939_s16 }
   0x7   :  { %p3946_p3 = por %p3945_p2, %p3944_p1 }
   0x9   :  { %p3947_p4 = pnand %p3946_p3, %p3940_p0 }
   0xb   :  { %3950 = shalt.err (!%p3947_p4)
}
   0xc   :  { %20 = dma.hbm_to_vmem [thread:$0]  %s5819_s0, 896, %s18_s13, [#allocation3]  }
   0xd   :  { %s3959_s19 = scalar_lea.vmem %s27_s15, 12544  ;;  %p3964_p6 = scmp.lt.s32.totalorder %s27_s15, %s27_s15 }
   0xe   :  { %p3960_p5 = scmp.ne.s32.totalorder %s27_s15, %s3959_s19  ;;  %p3965_p7 = scmp.lt.s32.totalorder %s3959_s19, %s3959_s19 }
  0x10   :  { %p3966_p8 = por %p3965_p7, %p3964_p6 }
  0x12   :  { %p3967_p9 = pnand %p3966_p8, %p3960_p5 }
  0x14   :  { %3970 = shalt.err (!%p3967_p9)
}
  0x15   :  { %s3999_s20 = smov 128   ;;  %s4000_s21 = smov 8  }
  0x16   :  { %32 = dma.hbm_to_vmem [thread:$0]  %s5820_s1, 12544, %s27_s15, [#allocation6], %s3999_s20, %s3999_s20, %s4000_s21  }
  0x17   :  { %3991 = dma.done.wait [#allocation3], 896  }
  0x18   :  { %3992 = vsyncadd [#allocation3], 4294966400 }
  0x19   :  { %3993 = dma.done.wait [#allocation6], 12544  }
  0x1a   :  { %3994 = vsyncadd [#allocation6], 4294954752  ;;  %v79_v0 = vld [vmem:[#allocation5 + $0xf8] sm:$0xff]  ;;  %v78_v2 = vld [vmem:[#allocation5 + $0xf0] sm:$0xff]  ;;  %vm153_vm0 = vcmask 130048   ;;  %vm4002_vm1 = vmmov 0  }
  0x1b   :  { %v63_v1 = vld [vmem:[#allocation5 + $0x78] sm:$0xff]  ;;  %v4030_v3 = vand.u32 4294901760, %v79_v0  ;;  %v4034_v5 = vand.u32 4294901760, %v78_v2  ;;  %v62_v6 = vld [vmem:[#allocation5 + $0x70] sm:$0xff]  ;;  %v77_v7 = vld [vmem:[#allocation5 + $0xe8] sm:$0xff] }
  0x1c   :  { %v4032_v4 = vand.u32 4294901760, %v63_v1  ;;  %v61_v8 = vld [vmem:[#allocation5 + $0x68] sm:$0xff]  ;;  %v4036_v9 = vand.u32 4294901760, %v62_v6  ;;  %v4038_v10 = vand.u32 4294901760, %v77_v7  ;;  %v76_v12 = vld [vmem:[#allocation5 + $0xe0] sm:$0xff]  ;;  %v75_v14 = vld [vmem:[#allocation5 + $0xd8] sm:$0xff] }
  0x1d   :  { %v4040_v11 = vand.u32 4294901760, %v61_v8  ;;  %v60_v13 = vld [vmem:[#allocation5 + $0x60] sm:$0xff]  ;;  %3230 = vmatprep.subr.mxu0 %v4030_v3  ;;  %v4043_v15 = vand.u32 4294901760, %v76_v12  ;;  %v4047_v17 = vand.u32 4294901760, %v75_v14  ;;  %v4050_v18 = vsub.f32 %v79_v0, %v4030_v3  ;;  %v4052_v19 = vld [vmem:[#allocation5 + $0x58] sm:$0xff]  ;;  %v4054_v20 = vld [vmem:[#allocation5 + $0xd0] sm:$0xff] }
  0x1e   :  { %v4045_v16 = vand.u32 4294901760, %v60_v13  ;;  %v4056_v21 = vld [vmem:[#allocation5 + $0x50] sm:$0xff]  ;;  %3231 = vmatpush3.msra.mxu0 %v4032_v4  ;;  %v4060_v22 = vand.u32 4294901760, %v4052_v19  ;;  %v4063_v23 = vsub.f32 %v63_v1, %v4032_v4  ;;  %v4066_v24 = vand.u32 4294901760, %v4054_v20  ;;  %v4071_v26 = vld [vmem:[#allocation5 + $0xc8] sm:$0xff]  ;;  %v4075_v28 = vld [vmem:[#allocation5 + $0xc0] sm:$0xff] }
  0x1f   :  { %v4069_v25 = vsub.f32 %v78_v2, %v4034_v5  ;;  %v4073_v27 = vld [vmem:[#allocation5 + $0x48] sm:$0xff]  ;;  %3232 = vmatprep.subr.mxu0 %v4034_v5  ;;  %v5836_v29 = vand.u32 4294901760, %v4050_v18  ;;  %v4080_v30 = vand.u32 4294901760, %v4056_v21  ;;  %v4083_v31 = vsub.f32 %v62_v6, %v4036_v9  ;;  %v4097_v37 = vld [vmem:[#allocation5 + $0x40] sm:$0xff]  ;;  %v4121_v46 = vld [vmem:[#allocation5 + $0xb8] sm:$0xff] }
  0x20   :  { %6025 = vst [vmem:[#allocation11_spill] sm:$0xff] %v4066_v24  ;;  %v4086_v32 = vand.u32 4294901760, %v4071_v26  ;;  %3233 = vmatpush3.msra.mxu0 %v4036_v9  ;;  %v5834_v33 = vand.u32 4294901760, %v4063_v23  ;;  %v4092_v35 = vsub.f32 %v77_v7, %v4038_v10  ;;  %v4095_v36 = vand.u32 4294901760, %v4073_v27  ;;  %v4131_v51 = vld [vmem:[#allocation5 + $0x38] sm:$0xff]  ;;  %v4138_v56 = vld [vmem:[#allocation5 + $0xb0] sm:$0xff] }
  0x21   :  { %6026 = vst [vmem:[#allocation12_spill] sm:$0xff] %v4080_v30  ;;  %v5833_v34 = vand.u32 4294901760, %v4069_v25  ;;  %3234 = vmatprep.subr.mxu0 %v4038_v10  ;;  %v385_v38 = vsub.f32 %v4050_v18, %v5836_v29  ;;  %v5831_v39 = vand.u32 4294901760, %v4083_v31  ;;  %v4105_v40 = vsub.f32 %v61_v8, %v4040_v11  ;;  %v4150_v61 = vld [vmem:[#allocation5 + $0x30] sm:$0xff]  ;;  %v4162_v2 = vld [vmem:[#allocation5 + $0xa8] sm:$0xff] }
  0x22   :  { %6027 = vst [vmem:[#allocation13_spill] sm:$0xff] %v4086_v32  ;;  %6028 = vst [vmem:[#allocation14_spill] sm:$0xff] %v4095_v36  ;;  %v4108_v41 = vand.u32 4294901760, %v4075_v28  ;;  %3235 = vmatpush3.msra.mxu0 %v4040_v11  ;;  %v273_v42 = vsub.f32 %v4063_v23, %v5834_v33  ;;  %v5829_v44 = vand.u32 4294901760, %v4092_v35  ;;  %v4119_v45 = vsub.f32 %v76_v12, %v4043_v15 }
  0x23   :  { %v392_v43 = vsub.f32 %v4069_v25, %v5833_v34  ;;  %3236 = vmatprep.subr.mxu0 %v4043_v15  ;;  %v386_v47 = vand.u32 4294901760, %v385_v38  ;;  %v280_v48 = vsub.f32 %v4083_v31, %v5831_v39  ;;  %v5828_v49 = vand.u32 4294901760, %v4105_v40  ;;  %v4253_v39 = vld [vmem:[#allocation5 + $0x90] sm:$0xff] }
  0x24   :  { %6029 = vst [vmem:[#allocation15_spill] sm:$0xff] %v4108_v41  ;;  %v4129_v50 = vand.u32 4294901760, %v4097_v37  ;;  %3237 = vmatpush3.msra.mxu0 %v4045_v16  ;;  %v274_v52 = vand.u32 4294901760, %v273_v42  ;;  %v399_v54 = vsub.f32 %v4092_v35, %v5829_v44  ;;  %v5826_v55 = vand.u32 4294901760, %v4119_v45  ;;  %v4263_v34 = vld [vmem:[#allocation5 + $0x10] sm:$0xff] }
  0x25   :  { %v393_v53 = vand.u32 4294901760, %v392_v43  ;;  %3238 = vmatprep.subr.mxu0 %v4047_v17  ;;  %3265 = vmatprep.subr.mxu1 %v386_v47  ;;  %v281_v57 = vand.u32 4294901760, %v280_v48  ;;  %v287_v58 = vsub.f32 %v4105_v40, %v5828_v49  ;;  %v4145_v59 = vsub.f32 %v60_v13, %v4045_v16  ;;  %v4173_v13 = vld [vmem:[#allocation5 + $0x28] sm:$0xff]  ;;  %v4240_v49 = vld [vmem:[#allocation5 + $0x18] sm:$0xff] }
  0x26   :  { %6030 = vst [vmem:[#allocation16_spill] sm:$0xff] %v4129_v50  ;;  %v4148_v60 = vand.u32 4294901760, %v4121_v46  ;;  %3239 = vmatpush3.msra.mxu0 %v4060_v22  ;;  %3266 = vmatpush3.msra.mxu1 %v274_v52  ;;  %v400_v62 = vand.u32 4294901760, %v399_v54  ;;  %v406_v63 = vsub.f32 %v4119_v45, %v5826_v55  ;;  %v4157_v0 = vsub.f32 %v75_v14, %v4047_v17 }
  0x27   :  { %v4160_v1 = vand.u32 4294901760, %v4131_v51  ;;  %3240 = vmatprep.subr.mxu0 %v4066_v24  ;;  %3267 = vmatprep.subr.mxu1 %v393_v53  ;;  %v288_v6 = vand.u32 4294901760, %v287_v58  ;;  %v5824_v7 = vand.u32 4294901760, %v4145_v59  ;;  %v4168_v8 = vsub.f32 %v4052_v19, %v4060_v22 }
  0x28   :  { %6031 = vst [vmem:[#allocation17_spill] sm:$0xff] %v4148_v60  ;;  %v4171_v12 = vand.u32 4294901760, %v4138_v56  ;;  %3241 = vmatpush3.msra.mxu0 %v4080_v30  ;;  %3268 = vmatpush3.msra.mxu1 %v281_v57  ;;  %v407_v14 = vand.u32 4294901760, %v406_v63  ;;  %v5823_v38 = vand.u32 4294901760, %v4157_v0  ;;  %v4179_v42 = vsub.f32 %v4054_v20, %v4066_v24  ;;  %v4196_v20 = vld [vmem:[#allocation5 + $0xa0] sm:$0xff] }
  0x29   :  { %6032 = vst [vmem:[#allocation18_spill] sm:$0xff] %v4160_v1  ;;  %v4182_v43 = vand.u32 4294901760, %v4150_v61  ;;  %3242 = vmatprep.subr.mxu0 %v4086_v32  ;;  %3269 = vmatprep.subr.mxu1 %v400_v62  ;;  %v294_v19 = vsub.f32 %v4145_v59, %v5824_v7  ;;  %v5825_v47 = vand.u32 4294901760, %v4168_v8  ;;  %v4191_v48 = vsub.f32 %v4056_v21, %v4080_v30 }
  0x2a   :  { %6033 = vst [vmem:[#allocation19_spill] sm:$0xff] %v4171_v12  ;;  %v4194_v52 = vand.u32 4294901760, %v4162_v2  ;;  %3243 = vmatpush3.msra.mxu0 %v4095_v36  ;;  %3270 = vmatpush3.msra.mxu1 %v288_v6  ;;  %v413_v53 = vsub.f32 %v4157_v0, %v5823_v38  ;;  %v5827_v54 = vand.u32 4294901760, %v4179_v42  ;;  %v4205_v57 = vsub.f32 %v4071_v26, %v4086_v32  ;;  %v4219_v38 = vld [vmem:[#allocation5 + $0x20] sm:$0xff] }
  0x2b   :  { %6034 = vst [vmem:[#allocation20_spill] sm:$0xff] %v4182_v43  ;;  %v4208_v21 = vand.u32 4294901760, %v4173_v13  ;;  %3244 = vmatprep.subr.mxu0 %v4108_v41  ;;  %3271 = vmatprep.subr.mxu1 %v407_v14  ;;  %v295_v58 = vand.u32 4294901760, %v294_v19  ;;  %v301_v62 = vsub.f32 %v4168_v8, %v5825_v47  ;;  %v5830_v63 = vand.u32 4294901760, %v4191_v48  ;;  %v4229_v47 = vld [vmem:[#allocation5 + $0x98] sm:$0xff] }
  0x2c   :  { %6035 = vst [vmem:[#allocation21_spill] sm:$0xff] %v4194_v52  ;;  %v4217_v6 = vsub.f32 %v4073_v27, %v4095_v36  ;;  %3245 = vmatpush3.msra.mxu0 %v4129_v50  ;;  %v414_v26 = vand.u32 4294901760, %v413_v53  ;;  %v420_v14 = vsub.f32 %v4179_v42, %v5827_v54  ;;  %v5832_v19 = vand.u32 4294901760, %v4205_v57  ;;  %v42_v36 = vld [vmem:[#allocation2 + $0x8] sm:$0xff] }
  0x2d   :  { %6036 = vst [vmem:[#allocation22_spill] sm:$0xff] %v4208_v21  ;;  %v4227_v7 = vand.u32 4294901760, %v4196_v20  ;;  %3272 = vmatpush3.msra.mxu1 %v295_v58  ;;  %3246 = vmatprep.subr.mxu0 %v4148_v60  ;;  %v302_v27 = vand.u32 4294901760, %v301_v62  ;;  %v308_v55 = vsub.f32 %v4191_v48, %v5830_v63  ;;  %v4238_v54 = vsub.f32 %v4075_v28, %v4108_v41 }
  0x2e   :  { %v5835_v53 = vand.u32 4294901760, %v4217_v6  ;;  %3273 = vmatprep.subr.mxu1 %v414_v26  ;;  %3247 = vmatpush3.msra.mxu0 %v4160_v1  ;;  %v421_v44 = vand.u32 4294901760, %v420_v14  ;;  %v427_v58 = vsub.f32 %v4205_v57, %v5832_v19  ;;  %v4247_v62 = vand.u32 4294901760, %v4219_v38 }
  0x2f   :  { %6037 = vst [vmem:[#allocation23_spill] sm:$0xff] %v4227_v7  ;;  %v4251_v63 = vsub.f32 %v4097_v37, %v4129_v50  ;;  %3274 = vmatpush3.msra.mxu1 %v302_v27  ;;  %3248 = vmatprep.subr.mxu0 %v4171_v12  ;;  %v309_v28 = vand.u32 4294901760, %v308_v55  ;;  %v5839_v14 = vand.u32 4294901760, %v4238_v54  ;;  %v4261_v19 = vand.u32 4294901760, %v4229_v47 }
  0x30   :  { %6038 = vst [vmem:[#allocation24_spill] sm:$0xff] %v4247_v62  ;;  %v315_v26 = vsub.f32 %v4217_v6, %v5835_v53  ;;  %3275 = vmatprep.subr.mxu1 %v421_v44  ;;  %3249 = vmatpush3.msra.mxu0 %v4182_v43  ;;  %v428_v37 = vand.u32 4294901760, %v427_v58  ;;  %v4269_v55 = vsub.f32 %v4121_v46, %v4148_v60  ;;  %v4272_v33 = vand.u32 4294901760, %v4240_v49  ;;  %v4274_v53 = vld [vmem:[#allocation5 + $0x88] sm:$0xff] }
  0x31   :  { %v5842_v27 = vand.u32 4294901760, %v4251_v63  ;;  %3276 = vmatpush3.msra.mxu1 %v309_v28  ;;  %3250 = vmatprep.subr.mxu0 %v4194_v52  ;;  %v434_v44 = vsub.f32 %v4238_v54, %v5839_v14  ;;  %v4282_v58 = vsub.f32 %v4131_v51, %v4160_v1  ;;  %v4285_v46 = vand.u32 4294901760, %v4253_v39  ;;  %v4299_v51 = vld [vmem:[#allocation5 + $0x8] sm:$0xff] }
  0x32   :  { %6039 = vst [vmem:[#allocation25_spill] sm:$0xff] %v4272_v33  ;;  %v316_v29 = vand.u32 4294901760, %v315_v26  ;;  %3277 = vmatprep.subr.mxu1 %v428_v37  ;;  %3251 = vmatpush3.msra.mxu0 %v4208_v21  ;;  %v4294_v60 = vsub.f32 %v4138_v56, %v4171_v12  ;;  %v4297_v14 = vand.u32 4294901760, %v4263_v34  ;;  %v4308_v26 = vand.u32 4294901760, %v4274_v53  ;;  %v4310_v56 = vld [vmem:[#allocation5 + $0x80] sm:$0xff] }
  0x33   :  { %6040 = vst [vmem:[#allocation26_spill] sm:$0xff] %v4285_v46  ;;  %v322_v28 = vsub.f32 %v4251_v63, %v5842_v27  ;;  %3252 = vmatprep.subr.mxu0 %v4227_v7  ;;  %v435_v37 = vand.u32 4294901760, %v434_v44  ;;  %v4305_v27 = vsub.f32 %v4150_v61, %v4182_v43  ;;  %v6043_v50 = vand.u32 4294901760, %v4269_v55  ;;  %v4333_v44 = vld [vmem:[#allocation5] sm:$0xff] }
  0x34   :  { %6041 = vst [vmem:[#allocation27_spill] sm:$0xff] %v4297_v14  ;;  %3278 = vmatpush3.msra.mxu1 %v316_v29  ;;  %6042 = vst [vmem:[#allocation28_spill] sm:$0xff] %v4308_v26  ;;  %3253 = vmatpush3.msra.mxu0 %v4247_v62  ;;  %v4319_v1 = vsub.f32 %v4162_v2, %v4194_v52  ;;  %v6045_v61 = vand.u32 4294901760, %v4282_v58  ;;  %v4341_v41 = vand.u32 4294901760, %v4310_v56  ;;  %v4357_v24 = vand.u32 4294901760, %v4333_v44 }
  0x35   :  { %v323_v12 = vand.u32 4294901760, %v322_v28  ;;  %v441_v29 = vsub.f32 %v4269_v55, %v6043_v50  ;;  %3279 = vmatprep.subr.mxu1 %v435_v37  ;;  %3254 = vmatprep.subr.mxu0 %v4261_v19  ;;  %v4327_v28 = vand.u32 4294901760, %v4299_v51  ;;  %v4331_v50 = vsub.f32 %v4173_v13, %v4208_v21 }
  0x36   :  { %6044 = vst [vmem:[#allocation29_spill] sm:$0xff] %v4319_v1  ;;  %v329_v43 = vsub.f32 %v4282_v58, %v6045_v61  ;;  %3255 = vmatpush3.msra.mxu0 %v4272_v33  ;;  %v6046_v37 = vand.u32 4294901760, %v4294_v60  ;;  %v6047_v13 = vand.u32 4294901760, %v4305_v27  ;;  %v4350_v21 = vsub.f32 %v4196_v20, %v4227_v7 }
  0x37   :  { %3280 = vmatpush3.msra.mxu1 %v323_v12  ;;  %v442_v2 = vand.u32 4294901760, %v441_v29  ;;  %3256 = vmatprep.subr.mxu0 %v4285_v46  ;;  %v6048_v30 = vand.u32 4294901760, %v4319_v1  ;;  %v6049_v20 = vand.u32 4294901760, %v4331_v50  ;;  %v4368_v7 = vand.u32 4294901760, %v42_v36 }
  0x38   :  { %v448_v52 = vsub.f32 %v4294_v60, %v6046_v37  ;;  %v330_v32 = vand.u32 4294901760, %v329_v43  ;;  %v336_v12 = vsub.f32 %v4305_v27, %v6047_v13  ;;  %v41_v37 = vld [vmem:[#allocation2] sm:$0xff]  ;;  %3257 = vmatpush3.msra.mxu0 %v4297_v14  ;;  %v4361_v13 = vsub.f32 %v4219_v38, %v4247_v62 }
  0x39   :  { %3281 = vmatprep.subr.mxu1 %v442_v2  ;;  %v455_v43 = vsub.f32 %v4319_v1, %v6048_v30  ;;  %3258 = vmatprep.subr.mxu0 %v4308_v26  ;;  %v5867_v2 = vand.u32 4294901760, %v4350_v21  ;;  %6050 = vst [vmem:[#allocation30_spill] sm:$0xff] %v4368_v7  ;;  %v4376_v38 = vand.u32 4294901760, %v41_v37 }
  0x3a   :  { %v449_v61 = vand.u32 4294901760, %v448_v52  ;;  %3282 = vmatpush3.msra.mxu1 %v330_v32  ;;  %v337_v29 = vand.u32 4294901760, %v336_v12  ;;  %v343_v52 = vsub.f32 %v4331_v50, %v6049_v20  ;;  %3259 = vmatpush3.msra.mxu0 %v4327_v28  ;;  %v5868_v1 = vand.u32 4294901760, %v4361_v13 }
  0x3b   :  { %v456_v30 = vand.u32 4294901760, %v455_v43  ;;  %v4374_v32 = vsub.f32 %v4229_v47, %v4261_v19  ;;  %6051 = vst [vmem:[#allocation31_spill] sm:$0xff] %v4376_v38  ;;  %3260 = vmatprep.subr.mxu0 %v4341_v41  ;;  %v462_v20 = vsub.f32 %v4350_v21, %v5867_v2  ;;  %v4387_v43 = vsub.f32 %v4240_v49, %v4272_v33 }
  0x3c   :  { %3283 = vmatprep.subr.mxu1 %v449_v61  ;;  %v344_v12 = vand.u32 4294901760, %v343_v52  ;;  %v4383_v61 = vsub.f32 %v42_v36, %v4368_v7  ;;  %3261 = vmatpush3.msra.mxu0 %v4357_v24  ;;  %v350_v47 = vsub.f32 %v4361_v13, %v5868_v1  ;;  %v4395_v52 = vsub.f32 %v41_v37, %v4376_v38 }
  0x3d   :  { %3284 = vmatpush3.msra.mxu1 %v337_v29  ;;  %v4399_v36 = vsub.f32 %v4253_v39, %v4285_v46  ;;  %v463_v2 = vand.u32 4294901760, %v462_v20  ;;  %3300 = vmatprep.subr.mxu0 %v4050_v18  ;;  %v4406_v1 = vsub.f32 %v4263_v34, %v4297_v14  ;;  %v6052_v37 = vand.u32 4294901760, %v4374_v32 }
  0x3e   :  { %3285 = vmatprep.subr.mxu1 %v456_v30  ;;  %v5873_v49 = vand.u32 4294901760, %v4383_v61  ;;  %v5876_v30 = vand.u32 4294901760, %v4387_v43  ;;  %v351_v29 = vand.u32 4294901760, %v350_v47  ;;  %494 = vmatprep.mubr.f32.mxu1 %v4368_v7  ;;  %v4433_v14 = vsub.f32 %v4299_v51, %v4327_v28 }
  0x3f   :  { %3286 = vmatpush3.msra.mxu1 %v344_v12  ;;  %v469_v33 = vsub.f32 %v4374_v32, %v6052_v37  ;;  %v4423_v37 = vsub.f32 %v4274_v53, %v4308_v26  ;;  %v6053_v12 = vand.u32 4294901760, %v4395_v52  ;;  %v6054_v7 = vand.u32 4294901760, %v4399_v36 }
  0x40   :  { %3287 = vmatprep.subr.mxu1 %v463_v2  ;;  %v256_v20 = vsub.f32 %v4383_v61, %v5873_v49  ;;  %v357_v34 = vsub.f32 %v4387_v43, %v5876_v30  ;;  %6055 = vst [vmem:[#allocation32_spill] sm:$0xff] %v4433_v14  ;;  %v6056_v46 = vand.u32 4294901760, %v4406_v1 }
  0x41   :  { %3288 = vmatpush3.msra.mxu1 %v351_v29  ;;  %v470_v39 = vand.u32 4294901760, %v469_v33  ;;  %v262_v2 = vsub.f32 %v4395_v52, %v6053_v12  ;;  %v476_v49 = vsub.f32 %v4399_v36, %v6054_v7  ;;  %v5884_v33 = vand.u32 4294901760, %v4423_v37 }
  0x42   :  { %v257_v30 = vand.u32 4294901760, %v256_v20  ;;  %v358_v47 = vand.u32 4294901760, %v357_v34  ;;  %v364_v53 = vsub.f32 %v4406_v1, %v6056_v46  ;;  %v5883_v12 = vand.u32 4294901760, %v4433_v14 }
  0x43   :  { %3289 = vmatprep.subr.mxu1 %v470_v39  ;;  %v263_v29 = vand.u32 4294901760, %v262_v2  ;;  %v477_v26 = vand.u32 4294901760, %v476_v49  ;;  %v4442_v7 = vsub.f32 %v4310_v56, %v4341_v41  ;;  %v483_v20 = vsub.f32 %v4423_v37, %v5884_v33 }
  0x44   :  { %258 = vmatprep.mubr.f32.mxu0 %v257_v30  ;;  %3290 = vmatpush3.msra.mxu1 %v358_v47  ;;  %v365_v51 = vand.u32 4294901760, %v364_v53  ;;  %v4449_v46 = vsub.f32 %v4333_v44, %v4357_v24  ;;  %v371_v49 = vsub.f32 %v4433_v14, %v5883_v12  ;;  %v6059_v53 = vld [vmem:[#allocation11_spill] sm:$0xff]  ;;  %v6073_v33 = vand.u32 4294901760, %v4050_v18 }
  0x45   :  { %6057 = vst [vmem:[#allocation33_spill] sm:$0xff] %v4442_v7  ;;  %264 = vmatmul.mubr.f32.vlgmr.msra.gmra.mxu0 %v263_v29  ;;  %3291 = vmatprep.subr.mxu1 %v477_v26  ;;  %v5882_v56 = vand.u32 4294901760, %v4442_v7  ;;  %v484_v30 = vand.u32 4294901760, %v483_v20  ;;  %v6060_v29 = vld [vmem:[#allocation12_spill] sm:$0xff]  ;;  %v6062_v20 = vld [vmem:[#allocation13_spill] sm:$0xff]  ;;  %v6072_v12 = vld [vmem:[#allocation23_spill] sm:$0xff] }
  0x46   :  { %6058 = vst [vmem:[#allocation34_spill] sm:$0xff] %v4449_v46  ;;  %3301 = vmatpush3.msra.mxu0 %v4063_v23  ;;  %3292 = vmatpush3.msra.mxu1 %v365_v51  ;;  %v5881_v39 = vand.u32 4294901760, %v4449_v46  ;;  %v372_v34 = vand.u32 4294901760, %v371_v49  ;;  %v6061_v51 = vld [vmem:[#allocation29_spill] sm:$0xff]  ;;  %v6063_v49 = vld [vmem:[#allocation14_spill] sm:$0xff]  ;;  %v6081_v18 = vand.u32 4294901760, %v4092_v35 }
  0x47   :  { %3302 = vmatprep.subr.mxu0 %v4069_v25  ;;  %v490_v44 = vsub.f32 %v4442_v7, %v5882_v56  ;;  %631 = vmatprep.mubr.f32.mxu0 %v4383_v61  ;;  %v6071_v56 = vld [vmem:[#allocation22_spill] sm:$0xff] }
  0x48   :  { %3303 = vmatpush3.msra.mxu0 %v4083_v31  ;;  %3293 = vmatprep.subr.mxu1 %v484_v30  ;;  %v378_v26 = vsub.f32 %v4449_v46, %v5881_v39  ;;  %v6064_v30 = vld [vmem:[#allocation15_spill] sm:$0xff]  ;;  %v6070_v39 = vld [vmem:[#allocation21_spill] sm:$0xff] }
  0x49   :  { %3304 = vmatprep.subr.mxu0 %v4092_v35  ;;  %3294 = vmatpush3.msra.mxu1 %v372_v34  ;;  %v491_v47 = vand.u32 4294901760, %v490_v44  ;;  %v6065_v34 = vld [vmem:[#allocation16_spill] sm:$0xff]  ;;  %v6066_v44 = vld [vmem:[#allocation17_spill] sm:$0xff]  ;;  %v6086_v35 = vand.u32 4294901760, %v4395_v52 }
  0x4a   :  { %3305 = vmatpush3.msra.mxu0 %v4105_v40  ;;  %v379_v2 = vand.u32 4294901760, %v378_v26  ;;  %v6067_v26 = vld [vmem:[#allocation18_spill] sm:$0xff] }
  0x4b   :  { %3295 = vmatprep.subr.mxu1 %v491_v47  ;;  %3306 = vmatprep.subr.mxu0 %v4119_v45  ;;  %v6068_v47 = vld [vmem:[#allocation19_spill] sm:$0xff] }
  0x4c   :  { %3296 = vmatpush3.msra.mxu1 %v379_v2  ;;  %3307 = vmatpush3.msra.mxu0 %v4145_v59  ;;  %v6069_v2 = vld [vmem:[#allocation20_spill] sm:$0xff] }
  0x4d   :  { %496 = vmatmul.mubr.f32.vlgmr.msra.gmra.mxu1 %v4376_v38  ;;  %3308 = vmatprep.subr.mxu0 %v4157_v0  ;;  %v6074_v38 = vld [vmem:[#allocation25_spill] sm:$0xff] }
  0x4e   :  { %3335 = vmatprep.subr.mxu1 %v4030_v3  ;;  %3309 = vmatpush3.msra.mxu0 %v4168_v8 }
  0x4f   :  { %3336 = vmatpush3.msra.mxu1 %v4032_v4  ;;  %3310 = vmatprep.subr.mxu0 %v4179_v42 }
  0x50   :  { %3337 = vmatprep.subr.mxu1 %v4034_v5  ;;  %3311 = vmatpush3.msra.mxu0 %v4191_v48 }
  0x51   :  { %3338 = vmatpush3.msra.mxu1 %v4036_v9  ;;  %3312 = vmatprep.subr.mxu0 %v4205_v57 }
  0x52   :  { %3339 = vmatprep.subr.mxu1 %v4038_v10  ;;  %3313 = vmatpush3.msra.mxu0 %v4217_v6 }
  0x53   :  { %3340 = vmatpush3.msra.mxu1 %v4040_v11  ;;  %3314 = vmatprep.subr.mxu0 %v4238_v54 }
  0x54   :  { %3341 = vmatprep.subr.mxu1 %v4043_v15  ;;  %3315 = vmatpush3.msra.mxu0 %v4251_v63 }
  0x55   :  { %3342 = vmatpush3.msra.mxu1 %v4045_v16  ;;  %3316 = vmatprep.subr.mxu0 %v4269_v55 }
  0x56   :  { %3343 = vmatprep.subr.mxu1 %v4047_v17  ;;  %3317 = vmatpush3.msra.mxu0 %v4282_v58 }
  0x57   :  { %3344 = vmatpush3.msra.mxu1 %v4060_v22  ;;  %3318 = vmatprep.subr.mxu0 %v4294_v60 }
  0x58   :  { %3345 = vmatprep.subr.mxu1 %v6059_v53  ;;  %3319 = vmatpush3.msra.mxu0 %v4305_v27 }
  0x59   :  { %3346 = vmatpush3.msra.mxu1 %v6060_v29  ;;  %3320 = vmatprep.subr.mxu0 %v6061_v51 }
  0x5a   :  { %3347 = vmatprep.subr.mxu1 %v6062_v20  ;;  %3321 = vmatpush3.msra.mxu0 %v4331_v50 }
  0x5b   :  { %3348 = vmatpush3.msra.mxu1 %v6063_v49  ;;  %3322 = vmatprep.subr.mxu0 %v4350_v21 }
  0x5c   :  { %3349 = vmatprep.subr.mxu1 %v6064_v30  ;;  %3323 = vmatpush3.msra.mxu0 %v4361_v13 }
  0x5d   :  { %3350 = vmatpush3.msra.mxu1 %v6065_v34  ;;  %3324 = vmatprep.subr.mxu0 %v4374_v32 }
  0x5e   :  { %3351 = vmatprep.subr.mxu1 %v6066_v44  ;;  %3325 = vmatpush3.msra.mxu0 %v4387_v43 }
  0x5f   :  { %3352 = vmatpush3.msra.mxu1 %v6067_v26  ;;  %3326 = vmatprep.subr.mxu0 %v4399_v36 }
  0x60   :  { %3353 = vmatprep.subr.mxu1 %v6068_v47  ;;  %3327 = vmatpush3.msra.mxu0 %v4406_v1 }
  0x61   :  { %3354 = vmatpush3.msra.mxu1 %v6069_v2  ;;  %3328 = vmatprep.subr.mxu0 %v4423_v37 }
  0x62   :  { %3355 = vmatprep.subr.mxu1 %v6070_v39  ;;  %3329 = vmatpush3.msra.mxu0 %v4433_v14  ;;  %v6075_v14 = vand.u32 4294901760, %v4063_v23  ;;  %v6082_v23 = vand.u32 4294901760, %v4105_v40  ;;  %v6088_v40 = vand.u32 4294901760, %v4168_v8  ;;  %v95_v8 = vld [vmem:[#allocation5 + $0x178] sm:$0xff] }
  0x63   :  { %3356 = vmatpush3.msra.mxu1 %v6071_v56  ;;  %3330 = vmatprep.subr.mxu0 %v4442_v7  ;;  %v6076_v56 = vld [vmem:[#allocation26_spill] sm:$0xff]  ;;  %v6080_v7 = vld [vmem:[#allocation28_spill] sm:$0xff] }
  0x64   :  { %3357 = vmatprep.subr.mxu1 %v6072_v12  ;;  %3331 = vmatpush3.msra.mxu0 %v4449_v46  ;;  %v6077_v12 = vand.u32 4294901760, %v4069_v25  ;;  %v6078_v46 = vld [vmem:[#allocation27_spill] sm:$0xff]  ;;  %v6083_v25 = vand.u32 4294901760, %v4119_v45  ;;  %v6089_v45 = vand.u32 4294901760, %v4179_v42  ;;  %v6093_v42 = vand.u32 4294901760, %v4238_v54  ;;  %v93_v54 = vld [vmem:[#allocation5 + $0x168] sm:$0xff] }
  0x65   :  { %3358 = vmatpush3.msra.mxu1 %v4247_v62  ;;  %634 = vmatmul.mubr.f32.vlgmr.msra.gmra.mxu0 %v4395_v52  ;;  %v6079_v62 = vand.u32 4294901760, %v4083_v31  ;;  %v6084_v31 = vand.u32 4294901760, %v4383_v61  ;;  %v4592_v61 = vand.u32 4294901760, %v93_v54 }
  0x66   :  { %3359 = vmatprep.subr.mxu1 %v4261_v19  ;;  %3370 = vmatprep.subr.mxu0 %v6073_v33  ;;  %v6102_v33 = vand.u32 4294901760, %v4331_v50 }
  0x67   :  { %3360 = vmatpush3.msra.mxu1 %v6074_v38  ;;  %3371 = vmatpush3.msra.mxu0 %v6075_v14  ;;  %v6087_v14 = vand.u32 4294901760, %v4157_v0  ;;  %v6091_v0 = vand.u32 4294901760, %v4205_v57  ;;  %v110_v57 = vld [vmem:[#allocation5 + $0x1f0] sm:$0xff]  ;;  %6099 = vst [vmem:[#allocation11_spill] sm:$0xff] %v4592_v61  ;;  %v4620_v50 = vsub.f32 %v93_v54, %v4592_v61  ;;  %v6121_v54 = vld [vmem:[#allocation23_spill] sm:$0xff] }
  0x68   :  { %3361 = vmatprep.subr.mxu1 %v6076_v56  ;;  %3372 = vmatprep.subr.mxu0 %v6077_v12 }
  0x69   :  { %3362 = vmatpush3.msra.mxu1 %v6078_v46  ;;  %3373 = vmatpush3.msra.mxu0 %v6079_v62  ;;  %v6085_v62 = vand.u32 4294901760, %v4145_v59  ;;  %v6090_v59 = vand.u32 4294901760, %v4191_v48 }
  0x6a   :  { %3363 = vmatprep.subr.mxu1 %v6080_v7  ;;  %3374 = vmatprep.subr.mxu0 %v6081_v18  ;;  %v91_v18 = vld [vmem:[#allocation5 + $0x158] sm:$0xff] }
  0x6b   :  { %3364 = vmatpush3.msra.mxu1 %v4327_v28  ;;  %3375 = vmatpush3.msra.mxu0 %v6082_v23 }
  0x6c   :  { %3365 = vmatprep.subr.mxu1 %v4341_v41  ;;  %3376 = vmatprep.subr.mxu0 %v6083_v25  ;;  %v90_v25 = vld [vmem:[#allocation5 + $0x150] sm:$0xff] }
  0x6d   :  { %3366 = vmatpush3.msra.mxu1 %v4357_v24  ;;  %738 = vmatprep.mubr.f32.mxu1 %v6084_v31  ;;  %v6107_v31 = vand.u32 4294901760, %v4387_v43  ;;  %v6112_v43 = vand.u32 4294901760, %v4406_v1 }
  0x6e   :  { %3377 = vmatpush3.msra.mxu0 %v6085_v62  ;;  %742 = vmatmul.mubr.f32.vlgmr.msra.gmra.mxu1 %v6086_v35  ;;  %v106_v35 = vld [vmem:[#allocation5 + $0x1d0] sm:$0xff] }
  0x6f   :  { %3378 = vmatprep.subr.mxu0 %v6087_v14  ;;  %3405 = vmatprep.subr.mxu1 %v4030_v3  ;;  %v6092_v3 = vand.u32 4294901760, %v4217_v6  ;;  %v6096_v6 = vand.u32 4294901760, %v4282_v58  ;;  %v92_v58 = vld [vmem:[#allocation5 + $0x160] sm:$0xff] }
  0x70   :  { %3379 = vmatpush3.msra.mxu0 %v6088_v40  ;;  %3406 = vmatpush3.msra.mxu1 %v4032_v4  ;;  %v111_v4 = vld [vmem:[#allocation5 + $0x1f8] sm:$0xff] }
  0x71   :  { %3380 = vmatprep.subr.mxu0 %v6089_v45  ;;  %3407 = vmatprep.subr.mxu1 %v4034_v5  ;;  %v94_v5 = vld [vmem:[#allocation5 + $0x170] sm:$0xff]  ;;  %v4575_v48 = vand.u32 4294901760, %v111_v4  ;;  %v4647_v45 = vand.u32 4294901760, %v91_v18 }
  0x72   :  { %3381 = vmatpush3.msra.mxu0 %v6090_v59  ;;  %3408 = vmatpush3.msra.mxu1 %v4036_v9  ;;  %v6094_v9 = vand.u32 4294901760, %v4251_v63  ;;  %v109_v63 = vld [vmem:[#allocation5 + $0x1e8] sm:$0xff]  ;;  %v4653_v59 = vand.u32 4294901760, %v90_v25 }
  0x73   :  { %3382 = vmatprep.subr.mxu0 %v6091_v0  ;;  %3409 = vmatprep.subr.mxu1 %v4038_v10  ;;  %v6095_v10 = vand.u32 4294901760, %v4269_v55  ;;  %v4590_v55 = vand.u32 4294901760, %v110_v57  ;;  %v4600_v52 = vand.u32 4294901760, %v109_v63  ;;  %6111 = vst [vmem:[#allocation15_spill] sm:$0xff] %v4647_v45  ;;  %v5891_v0 = vand.u32 4294901760, %v4620_v50 }
  0x74   :  { %3383 = vmatpush3.msra.mxu0 %v6092_v3  ;;  %3410 = vmatpush3.msra.mxu1 %v4040_v11  ;;  %v4577_v11 = vand.u32 4294901760, %v95_v8  ;;  %6113 = vst [vmem:[#allocation16_spill] sm:$0xff] %v4653_v59 }
  0x75   :  { %3384 = vmatprep.subr.mxu0 %v6093_v42  ;;  %3411 = vmatprep.subr.mxu1 %v4043_v15  ;;  %v4582_v15 = vand.u32 4294901760, %v94_v5  ;;  %6101 = vst [vmem:[#allocation12_spill] sm:$0xff] %v4600_v52  ;;  %v4623_v23 = vsub.f32 %v110_v57, %v4590_v55  ;;  %v6116_v42 = vld [vmem:[#allocation32_spill] sm:$0xff] }
  0x76   :  { %3385 = vmatpush3.msra.mxu0 %v6094_v9  ;;  %3412 = vmatpush3.msra.mxu1 %v4045_v16  ;;  %v6097_v16 = vand.u32 4294901760, %v4294_v60  ;;  %v4598_v60 = vsub.f32 %v95_v8, %v4577_v11 }
  0x77   :  { %3386 = vmatprep.subr.mxu0 %v6095_v10  ;;  %3413 = vmatprep.subr.mxu1 %v4047_v17  ;;  %v6098_v17 = vand.u32 4294901760, %v4305_v27  ;;  %v4603_v27 = vsub.f32 %v111_v4, %v4575_v48  ;;  %v4609_v12 = vsub.f32 %v94_v5, %v4582_v15  ;;  %v105_v4 = vld [vmem:[#allocation5 + $0x1c8] sm:$0xff]  ;;  %v6118_v5 = vld [vmem:[#allocation22_spill] sm:$0xff] }
  0x78   :  { %3387 = vmatpush3.msra.mxu0 %v6096_v6  ;;  %3414 = vmatpush3.msra.mxu1 %v4060_v22  ;;  %v6100_v22 = vand.u32 4294901760, %v6061_v51  ;;  %v4614_v51 = vand.u32 4294901760, %v92_v58  ;;  %v6119_v10 = vld [vmem:[#allocation33_spill] sm:$0xff]  ;;  %v4687_v6 = vsub.f32 %v91_v18, %v4647_v45  ;;  %v4704_v18 = vsub.f32 %v90_v25, %v4653_v59 }
  0x79   :  { %3388 = vmatprep.subr.mxu0 %v6097_v16  ;;  %3415 = vmatprep.subr.mxu1 %v6059_v53  ;;  %v6103_v53 = vand.u32 4294901760, %v4350_v21  ;;  %v6106_v21 = vand.u32 4294901760, %v4374_v32  ;;  %v5893_v32 = vand.u32 4294901760, %v4609_v12  ;;  %v6120_v57 = vand.u32 4294901760, %v6119_v10  ;;  %v104_v16 = vld [vmem:[#allocation5 + $0x1c0] sm:$0xff] }
  0x7a   :  { %3389 = vmatpush3.msra.mxu0 %v6098_v17  ;;  %3416 = vmatpush3.msra.mxu1 %v6060_v29  ;;  %v108_v29 = vld [vmem:[#allocation5 + $0x1e0] sm:$0xff]  ;;  %6104 = vst [vmem:[#allocation29_spill] sm:$0xff] %v4614_v51  ;;  %v4643_v14 = vsub.f32 %v92_v58, %v4614_v51 }
  0x7b   :  { %3390 = vmatprep.subr.mxu0 %v6100_v22  ;;  %3417 = vmatprep.subr.mxu1 %v6062_v20  ;;  %v6105_v20 = vand.u32 4294901760, %v4361_v13  ;;  %v5896_v13 = vand.u32 4294901760, %v4598_v60  ;;  %v4636_v62 = vand.u32 4294901760, %v108_v29  ;;  %v88_v17 = vld [vmem:[#allocation5 + $0x140] sm:$0xff] }
  0x7c   :  { %3391 = vmatpush3.msra.mxu0 %v6102_v33  ;;  %3418 = vmatpush3.msra.mxu1 %v6063_v49  ;;  %v107_v49 = vld [vmem:[#allocation5 + $0x1d8] sm:$0xff]  ;;  %v5894_v58 = vand.u32 4294901760, %v4643_v14  ;;  %v6123_v33 = vld [vmem:[#allocation34_spill] sm:$0xff] }
  0x7d   :  { %3392 = vmatprep.subr.mxu0 %v6103_v53  ;;  %3419 = vmatprep.subr.mxu1 %v6064_v30  ;;  %v5897_v30 = vand.u32 4294901760, %v4603_v27  ;;  %6108 = vst [vmem:[#allocation13_spill] sm:$0xff] %v4636_v62  ;;  %v4645_v40 = vand.u32 4294901760, %v107_v49  ;;  %v4667_v1 = vsub.f32 %v4598_v60, %v5896_v13  ;;  %v4681_v9 = vsub.f32 %v108_v29, %v4636_v62  ;;  %v6125_v29 = vld [vmem:[#allocation30_spill] sm:$0xff] }
  0x7e   :  { %3393 = vmatpush3.msra.mxu0 %v6105_v20  ;;  %3420 = vmatpush3.msra.mxu1 %v6065_v34  ;;  %v4631_v34 = vsub.f32 %v109_v63, %v4600_v52  ;;  %v6124_v53 = vand.u32 4294901760, %v6123_v33  ;;  %v87_v33 = vld [vmem:[#allocation5 + $0x138] sm:$0xff] }
  0x7f   :  { %3394 = vmatprep.subr.mxu0 %v6106_v21  ;;  %3421 = vmatprep.subr.mxu1 %v6066_v44  ;;  %v6109_v44 = vand.u32 4294901760, %v4399_v36  ;;  %6110 = vst [vmem:[#allocation14_spill] sm:$0xff] %v4645_v40  ;;  %v89_v36 = vld [vmem:[#allocation5 + $0x148] sm:$0xff]  ;;  %v4662_v3 = vsub.f32 %v4603_v27, %v5897_v30  ;;  %v4693_v22 = vsub.f32 %v107_v49, %v4645_v40  ;;  %v4706_v21 = vand.u32 4294901760, %v105_v4 }
  0x80   :  { %3395 = vmatpush3.msra.mxu0 %v6107_v31  ;;  %3422 = vmatpush3.msra.mxu1 %v6067_v26  ;;  %v5895_v26 = vand.u32 4294901760, %v4623_v23  ;;  %v5892_v8 = vand.u32 4294901760, %v4631_v34  ;;  %v4689_v63 = vand.u32 4294901760, %v89_v36  ;;  %v4711_v49 = vsub.f32 %v4620_v50, %v5891_v0  ;;  %v6127_v31 = vld [vmem:[#allocation24_spill] sm:$0xff]  ;;  %v86_v0 = vld [vmem:[#allocation5 + $0x130] sm:$0xff]  ;;  %v85_v30 = vld [vmem:[#allocation5 + $0x128] sm:$0xff] }
  0x81   :  { %3396 = vmatprep.subr.mxu0 %v6109_v44  ;;  %3423 = vmatprep.subr.mxu1 %v6068_v47  ;;  %v6114_v47 = vand.u32 4294901760, %v4423_v37  ;;  %v6117_v37 = vand.u32 4294901760, %v6116_v42  ;;  %6126 = vst [vmem:[#allocation19_spill] sm:$0xff] %v4706_v21  ;;  %v6128_v44 = vld [vmem:[#allocation31_spill] sm:$0xff]  ;;  %v5898_v10 = vand.u32 4294901760, %v4681_v9  ;;  %v4760_v13 = vand.u32 4294901760, %v87_v33 }
  0x82   :  { %3397 = vmatpush3.msra.mxu0 %v6112_v43  ;;  %3424 = vmatpush3.msra.mxu1 %v6069_v2  ;;  %v4669_v2 = vand.u32 4294901760, %v106_v35  ;;  %6122 = vst [vmem:[#allocation18_spill] sm:$0xff] %v4689_v63  ;;  %v4701_v20 = vsub.f32 %v4623_v23, %v5895_v26  ;;  %v4720_v25 = vsub.f32 %v4631_v34, %v5892_v8  ;;  %v4773_v8 = vand.u32 4294901760, %v86_v0  ;;  %v100_v43 = vld [vmem:[#allocation5 + $0x1a0] sm:$0xff] }
  0x83   :  { %3398 = vmatprep.subr.mxu0 %v6114_v47  ;;  %3425 = vmatprep.subr.mxu1 %v6070_v39  ;;  %v4678_v39 = vsub.f32 %v4609_v12, %v5893_v32  ;;  %v5901_v32 = vand.u32 4294901760, %v4704_v18  ;;  %6133 = vst [vmem:[#allocation27_spill] sm:$0xff] %v4760_v13  ;;  %v4802_v47 = vand.u32 4294901760, %v85_v30 }
  0x84   :  { %6115 = vst [vmem:[#allocation17_spill] sm:$0xff] %v4669_v2  ;;  %3399 = vmatpush3.msra.mxu0 %v6117_v37  ;;  %3426 = vmatpush3.msra.mxu1 %v6118_v5  ;;  %v4723_v42 = vsub.f32 %v106_v35, %v4669_v2  ;;  %v4728_v5 = vand.u32 4294901760, %v104_v16  ;;  %v4736_v35 = vsub.f32 %v89_v36, %v4689_v63  ;;  %v4749_v36 = vld [vmem:[#allocation5 + $0x1b0] sm:$0xff]  ;;  %6135 = vst [vmem:[#allocation32_spill] sm:$0xff] %v4773_v8  ;;  %v84_v37 = vld [vmem:[#allocation5 + $0x120] sm:$0xff] }
  0x85   :  { %3400 = vmatprep.subr.mxu0 %v6120_v57  ;;  %3427 = vmatprep.subr.mxu1 %v6121_v54  ;;  %v4731_v57 = vand.u32 4294901760, %v88_v17  ;;  %v103_v54 = vld [vmem:[#allocation5 + $0x1b8] sm:$0xff]  ;;  %6138 = vst [vmem:[#allocation23_spill] sm:$0xff] %v4802_v47 }
  0x86   :  { %3401 = vmatpush3.msra.mxu0 %v6124_v53  ;;  %908 = vmatprep.mubr.f32.mxu0 %v6125_v29  ;;  %6129 = vst [vmem:[#allocation20_spill] sm:$0xff] %v4728_v5  ;;  %6131 = vst [vmem:[#allocation25_spill] sm:$0xff] %v4736_v35  ;;  %v5899_v53 = vand.u32 4294901760, %v4693_v22  ;;  %v4776_v26 = vsub.f32 %v104_v16, %v4728_v5  ;;  %v4792_v16 = vand.u32 4294901760, %v4749_v36 }
  0x87   :  { %3428 = vmatpush3.msra.mxu1 %v6127_v31  ;;  %910 = vmatmul.mubr.f32.vlgmr.msra.gmra.mxu0 %v6128_v44  ;;  %6130 = vst [vmem:[#allocation21_spill] sm:$0xff] %v4731_v57  ;;  %v5900_v31 = vand.u32 4294901760, %v4687_v6 }
  0x88   :  { %3429 = vmatprep.subr.mxu1 %v4261_v19  ;;  %3440 = vmatprep.subr.mxu0 %v4575_v48  ;;  %v4741_v19 = vsub.f32 %v4643_v14, %v5894_v58  ;;  %v4753_v58 = vsub.f32 %v105_v4, %v4706_v21  ;;  %v4768_v4 = vsub.f32 %v4681_v9, %v5898_v10 }
  0x89   :  { %3430 = vmatpush3.msra.mxu1 %v6074_v38  ;;  %3441 = vmatpush3.msra.mxu0 %v4577_v11  ;;  %v1255_v38 = vand.u32 4294901760, %v4701_v20  ;;  %v5904_v20 = vand.u32 4294901760, %v4723_v42  ;;  %6136 = vst [vmem:[#allocation22_spill] sm:$0xff] %v4776_v26  ;;  %v4784_v10 = vsub.f32 %v4693_v22, %v5899_v53  ;;  %6137 = vst [vmem:[#allocation33_spill] sm:$0xff] %v4792_v16 }
  0x8a   :  { %3431 = vmatprep.subr.mxu1 %v6076_v56  ;;  %3442 = vmatprep.subr.mxu0 %v4590_v55  ;;  %v4758_v56 = vand.u32 4294901760, %v103_v54 }
  0x8b   :  { %3432 = vmatpush3.msra.mxu1 %v6078_v46  ;;  %3443 = vmatpush3.msra.mxu0 %v4582_v15  ;;  %v4771_v46 = vsub.f32 %v88_v17, %v4731_v57  ;;  %v4789_v17 = vsub.f32 %v4687_v6, %v5900_v31 }
  0x8c   :  { %6132 = vst [vmem:[#allocation26_spill] sm:$0xff] %v4758_v56  ;;  %3433 = vmatprep.subr.mxu1 %v6080_v7  ;;  %3444 = vmatprep.subr.mxu0 %v4600_v52  ;;  %v101_v7 = vld [vmem:[#allocation5 + $0x1a8] sm:$0xff]  ;;  %v4818_v53 = vsub.f32 %v103_v54, %v4758_v56  ;;  %v1276_v54 = vand.u32 4294901760, %v4784_v10  ;;  %v4847_v10 = vsub.f32 %v85_v30, %v4802_v47  ;;  %v82_v52 = vld [vmem:[#allocation5 + $0x110] sm:$0xff] }
  0x8d   :  { %6134 = vst [vmem:[#allocation28_spill] sm:$0xff] %v4771_v46  ;;  %3434 = vmatpush3.msra.mxu1 %v4327_v28  ;;  %3445 = vmatpush3.msra.mxu0 %v4592_v61  ;;  %v4799_v28 = vsub.f32 %v4704_v18, %v5901_v32  ;;  %v4813_v32 = vsub.f32 %v4723_v42, %v5904_v20  ;;  %v6141_v20 = vand.u32 4294901760, %v4662_v3  ;;  %v4833_v61 = vand.u32 4294901760, %v101_v7 }
  0x8e   :  { %3435 = vmatprep.subr.mxu1 %v4341_v41  ;;  %3446 = vmatprep.subr.mxu0 %v4636_v62  ;;  %v4808_v41 = vsub.f32 %v87_v33, %v4760_v13  ;;  %v4815_v62 = vand.u32 4294901760, %v84_v37  ;;  %6140 = vst [vmem:[#allocation30_spill] sm:$0xff] %v4818_v53  ;;  %v6143_v33 = vand.u32 4294901760, %v4667_v1  ;;  %v6144_v3 = vand.u32 4294901760, %v4753_v58 }
  0x8f   :  { %3436 = vmatpush3.msra.mxu1 %v4357_v24  ;;  %1012 = vmatprep.mubr.f32.mxu1 %v6125_v29  ;;  %v1269_v24 = vand.u32 4294901760, %v4768_v4  ;;  %v4824_v29 = vsub.f32 %v86_v0, %v4773_v8  ;;  %6142 = vst [vmem:[#allocation24_spill] sm:$0xff] %v4833_v61  ;;  %v83_v4 = vld [vmem:[#allocation5 + $0x118] sm:$0xff]  ;;  %v44_v0 = vld [vmem:[#allocation2 + $0x18] sm:$0xff]  ;;  %v1283_v1 = vand.u32 4294901760, %v4813_v32  ;;  %v4862_v30 = vsub.f32 %v4749_v36, %v4792_v16 }
  0x90   :  { %6139 = vst [vmem:[#allocation34_spill] sm:$0xff] %v4815_v62  ;;  %3447 = vmatpush3.msra.mxu0 %v4614_v51  ;;  %1014 = vmatmul.mubr.f32.vlgmr.msra.gmra.mxu1 %v6128_v44  ;;  %v1164_v51 = vand.u32 4294901760, %v4789_v17  ;;  %v4835_v44 = vand.u32 4294901760, %v100_v43  ;;  %v6145_v17 = vand.u32 4294901760, %v4736_v35  ;;  %v6149_v32 = vand.u32 4294901760, %v4771_v46 }
  0x91   :  { %3448 = vmatprep.subr.mxu0 %v4645_v40  ;;  %3475 = vmatprep.subr.mxu1 %v6141_v20  ;;  %v4844_v20 = vsub.f32 %v4753_v58, %v6144_v3  ;;  %v99_v3 = vld [vmem:[#allocation5 + $0x198] sm:$0xff]  ;;  %v4877_v31 = vand.u32 4294901760, %v83_v4  ;;  %v4879_v36 = vand.u32 4294901760, %v44_v0 }
  0x92   :  { %3449 = vmatpush3.msra.mxu0 %v4647_v45  ;;  %3476 = vmatpush3.msra.mxu1 %v6143_v33  ;;  %v4852_v40 = vsub.f32 %v4736_v35, %v6145_v17  ;;  %v43_v45 = vld [vmem:[#allocation2 + $0x10] sm:$0xff]  ;;  %v4857_v33 = vsub.f32 %v84_v37, %v4815_v62  ;;  %v6147_v17 = vand.u32 4294901760, %v4678_v39  ;;  %v4875_v37 = vsub.f32 %v4771_v46, %v6149_v32  ;;  %v98_v35 = vld [vmem:[#allocation5 + $0x190] sm:$0xff] }
  0x93   :  { %3450 = vmatprep.subr.mxu0 %v4669_v2  ;;  %3477 = vmatprep.subr.mxu1 %v1255_v38  ;;  %v6148_v2 = vand.u32 4294901760, %v4776_v26  ;;  %6150 = vst [vmem:[#allocation35_spill] sm:$0xff] %v4879_v36  ;;  %v6151_v39 = vand.u32 4294901760, %v4720_v25  ;;  %v6153_v32 = vand.u32 4294901760, %v4711_v49  ;;  %v1290_v46 = vand.u32 4294901760, %v4844_v20 }
  0x94   :  { %6146 = vst [vmem:[#allocation31_spill] sm:$0xff] %v4857_v33  ;;  %3451 = vmatpush3.msra.mxu0 %v4653_v59  ;;  %3478 = vmatpush3.msra.mxu1 %v6147_v17  ;;  %v4885_v59 = vand.u32 4294901760, %v82_v52  ;;  %v4897_v25 = vand.u32 4294901760, %v99_v3  ;;  %v4910_v20 = vsub.f32 %v100_v43, %v4835_v44  ;;  %v6157_v43 = vand.u32 4294901760, %v4808_v41 }
  0x95   :  { %v4870_v38 = vsub.f32 %v4776_v26, %v6148_v2  ;;  %3452 = vmatprep.subr.mxu0 %v4706_v21  ;;  %3479 = vmatprep.subr.mxu1 %v6151_v39  ;;  %v4888_v2 = vsub.f32 %v101_v7, %v4833_v61  ;;  %v4890_v26 = vand.u32 4294901760, %v43_v45  ;;  %v1178_v21 = vand.u32 4294901760, %v4852_v40 }
  0x96   :  { %3453 = vmatpush3.msra.mxu0 %v4689_v63  ;;  %3480 = vmatpush3.msra.mxu1 %v6153_v32  ;;  %v6154_v7 = vand.u32 4294901760, %v4818_v53  ;;  %v4906_v63 = vand.u32 4294901760, %v98_v35  ;;  %v97_v32 = vld [vmem:[#allocation5 + $0x188] sm:$0xff]  ;;  %v6156_v40 = vand.u32 4294901760, %v4741_v19  ;;  %v1185_v39 = vand.u32 4294901760, %v4875_v37  ;;  %v96_v37 = vld [vmem:[#allocation5 + $0x180] sm:$0xff] }
  0x97   :  { %6152 = vst [vmem:[#allocation36_spill] sm:$0xff] %v4890_v26  ;;  %3454 = vmatprep.subr.mxu0 %v4728_v5  ;;  %3481 = vmatprep.subr.mxu1 %v1269_v24  ;;  %v1297_v24 = vand.u32 4294901760, %v4870_v38  ;;  %v81_v5 = vld [vmem:[#allocation5 + $0x108] sm:$0xff]  ;;  %v1191_v49 = vsub.f32 %v4808_v41, %v6157_v43  ;;  %v4928_v19 = vsub.f32 %v82_v52, %v4885_v59  ;;  %v6159_v38 = vand.u32 4294901760, %v4862_v30 }
  0x98   :  { %v4904_v17 = vsub.f32 %v4818_v53, %v6154_v7  ;;  %6155 = vst [vmem:[#allocation37_spill] sm:$0xff] %v4906_v63  ;;  %3455 = vmatpush3.msra.mxu0 %v4731_v57  ;;  %3482 = vmatpush3.msra.mxu1 %v6156_v40  ;;  %v4918_v7 = vsub.f32 %v83_v4, %v4877_v31  ;;  %v80_v40 = vld [vmem:[#allocation5 + $0x100] sm:$0xff]  ;;  %v6160_v43 = vand.u32 4294901760, %v4799_v28  ;;  %v5945_v28 = vand.u32 4294901760, %v4857_v33 }
  0x99   :  { %v4921_v53 = vsub.f32 %v44_v0, %v4879_v36  ;;  %3456 = vmatprep.subr.mxu0 %v4758_v56  ;;  %3483 = vmatprep.subr.mxu1 %v1276_v54  ;;  %v4932_v4 = vsub.f32 %v43_v45, %v4890_v26  ;;  %v6158_v0 = vand.u32 4294901760, %v4824_v29  ;;  %v4938_v56 = vand.u32 4294901760, %v97_v32 }
  0x9a   :  { %3457 = vmatpush3.msra.mxu0 %v4760_v13  ;;  %3484 = vmatpush3.msra.mxu1 %v1164_v51  ;;  %v4942_v52 = vsub.f32 %v99_v3, %v4897_v25  ;;  %v1304_v45 = vand.u32 4294901760, %v4904_v17  ;;  %v1310_v51 = vsub.f32 %v4862_v30, %v6159_v38  ;;  %v4949_v13 = vand.u32 4294901760, %v81_v5 }
  0x9b   :  { %v1198_v54 = vsub.f32 %v4824_v29, %v6158_v0  ;;  %3458 = vmatprep.subr.mxu0 %v4792_v16  ;;  %3485 = vmatprep.subr.mxu1 %v1283_v1  ;;  %v4955_v3 = vand.u32 4294901760, %v96_v37  ;;  %v4957_v57 = vand.u32 4294901760, %v80_v40  ;;  %v4961_v17 = vsub.f32 %v98_v35, %v4906_v63 }
  0x9c   :  { %3459 = vmatpush3.msra.mxu0 %v4773_v8  ;;  %3486 = vmatpush3.msra.mxu1 %v6160_v43  ;;  %v1192_v38 = vand.u32 4294901760, %v1191_v49  ;;  %v6161_v0 = vand.u32 4294901760, %v4888_v2  ;;  %v6162_v1 = vand.u32 4294901760, %v4847_v10  ;;  %v1311_v49 = vand.u32 4294901760, %v1310_v51 }
  0x9d   :  { %3460 = vmatprep.subr.mxu0 %v4833_v61  ;;  %3487 = vmatprep.subr.mxu1 %v1290_v46  ;;  %v1199_v16 = vand.u32 4294901760, %v1198_v54  ;;  %v4975_v46 = vsub.f32 %v97_v32, %v4938_v56  ;;  %v6163_v43 = vand.u32 4294901760, %v4910_v20  ;;  %v6165_v32 = vand.u32 4294901760, %v4921_v53 }
  0x9e   :  { %v1317_v8 = vsub.f32 %v4888_v2, %v6161_v0  ;;  %3461 = vmatpush3.msra.mxu0 %v4802_v47  ;;  %3488 = vmatpush3.msra.mxu1 %v1178_v21  ;;  %v1205_v35 = vsub.f32 %v4847_v10, %v6162_v1  ;;  %v4979_v0 = vsub.f32 %v81_v5, %v4949_v13 }
  0x9f   :  { %3462 = vmatprep.subr.mxu0 %v4835_v44  ;;  %3489 = vmatprep.subr.mxu1 %v1297_v24  ;;  %v1324_v21 = vsub.f32 %v4910_v20, %v6163_v43  ;;  %v4987_v1 = vsub.f32 %v80_v40, %v4957_v57  ;;  %v1118_v24 = vsub.f32 %v4921_v53, %v6165_v32  ;;  %v6167_v40 = vand.u32 4294901760, %v4932_v4 }
  0xa0   :  { %3463 = vmatpush3.msra.mxu0 %v4815_v62  ;;  %3490 = vmatpush3.msra.mxu1 %v1185_v39  ;;  %v4994_v5 = vsub.f32 %v96_v37, %v4955_v3  ;;  %v1318_v43 = vand.u32 4294901760, %v1317_v8  ;;  %v1212_v39 = vsub.f32 %v4857_v33, %v5945_v28  ;;  %v1206_v32 = vand.u32 4294901760, %v1205_v35 }
  0xa1   :  { %6164 = vst [vmem:[#allocation38_spill] sm:$0xff] %v4987_v1  ;;  %3464 = vmatprep.subr.mxu0 %v4897_v25  ;;  %3491 = vmatprep.subr.mxu1 %v1304_v45  ;;  %v1124_v54 = vsub.f32 %v4932_v4, %v6167_v40  ;;  %v6168_v37 = vand.u32 4294901760, %v4942_v52  ;;  %v1325_v45 = vand.u32 4294901760, %v1324_v21  ;;  %v6169_v28 = vand.u32 4294901760, %v4918_v7 }
  0xa2   :  { %6166 = vst [vmem:[#allocation39_spill] sm:$0xff] %v4994_v5  ;;  %3465 = vmatpush3.msra.mxu0 %v4877_v31  ;;  %3492 = vmatpush3.msra.mxu1 %v1192_v38  ;;  %v1119_v38 = vand.u32 4294901760, %v1118_v24  ;;  %v6170_v35 = vand.u32 4294901760, %v4961_v17  ;;  %v5949_v8 = vand.u32 4294901760, %v4994_v5  ;;  %v5948_v61 = vand.u32 4294901760, %v4987_v1 }
  0xa3   :  { %v1331_v51 = vsub.f32 %v4942_v52, %v6168_v37  ;;  %3466 = vmatprep.subr.mxu0 %v4906_v63  ;;  %3493 = vmatprep.subr.mxu1 %v1311_v49  ;;  %v1219_v40 = vsub.f32 %v4918_v7, %v6169_v28  ;;  %v1213_v49 = vand.u32 4294901760, %v1212_v39  ;;  %v1125_v21 = vand.u32 4294901760, %v1124_v54 }
  0xa4   :  { %3467 = vmatpush3.msra.mxu0 %v4885_v59  ;;  %3494 = vmatpush3.msra.mxu1 %v1199_v16  ;;  %v1338_v37 = vsub.f32 %v4961_v17, %v6170_v35  ;;  %v6171_v63 = vand.u32 4294901760, %v4928_v19  ;;  %v6172_v24 = vand.u32 4294901760, %v4975_v46  ;;  %v6173_v54 = vand.u32 4294901760, %v4979_v0 }
  0xa5   :  { %3468 = vmatprep.subr.mxu0 %v4938_v56  ;;  %3495 = vmatprep.subr.mxu1 %v1318_v43  ;;  %v1332_v16 = vand.u32 4294901760, %v1331_v51  ;;  %v1220_v43 = vand.u32 4294901760, %v1219_v40  ;;  %v1352_v51 = vsub.f32 %v4994_v5, %v5949_v8  ;;  %v6191_v8 = vld [vmem:[#allocation27_spill] sm:$0xff] }
  0xa6   :  { %v1226_v28 = vsub.f32 %v4928_v19, %v6171_v63  ;;  %3469 = vmatpush3.msra.mxu0 %v4949_v13  ;;  %3496 = vmatpush3.msra.mxu1 %v1206_v32  ;;  %v1345_v35 = vsub.f32 %v4975_v46, %v6172_v24  ;;  %v1233_v39 = vsub.f32 %v4979_v0, %v6173_v54  ;;  %v1339_v63 = vand.u32 4294901760, %v1338_v37  ;;  %v6177_v24 = vld [vmem:[#allocation22_spill] sm:$0xff]  ;;  %v6180_v54 = vld [vmem:[#allocation29_spill] sm:$0xff] }
  0xa7   :  { %3470 = vmatprep.subr.mxu0 %v4955_v3  ;;  %3497 = vmatprep.subr.mxu1 %v1325_v45  ;;  %v1240_v45 = vsub.f32 %v4987_v1, %v5948_v61  ;;  %v1353_v37 = vand.u32 4294901760, %v1352_v51  ;;  %v6183_v51 = vld [vmem:[#allocation15_spill] sm:$0xff]  ;;  %v6190_v61 = vld [vmem:[#allocation26_spill] sm:$0xff] }
  0xa8   :  { %3471 = vmatpush3.msra.mxu0 %v4957_v57  ;;  %1120 = vmatprep.mubr.f32.mxu0 %v1119_v38  ;;  %v1227_v32 = vand.u32 4294901760, %v1226_v28  ;;  %v1346_v40 = vand.u32 4294901760, %v1345_v35  ;;  %v1234_v38 = vand.u32 4294901760, %v1233_v39  ;;  %v6175_v28 = vld [vmem:[#allocation25_spill] sm:$0xff]  ;;  %v6181_v39 = vld [vmem:[#allocation30_spill] sm:$0xff] }
  0xa9   :  { %3498 = vmatpush3.msra.mxu1 %v1213_v49  ;;  %1126 = vmatmul.mubr.f32.vlgmr.msra.gmra.mxu0 %v1125_v21  ;;  %v1241_v49 = vand.u32 4294901760, %v1240_v45  ;;  %v6174_v21 = vld [vmem:[#allocation12_spill] sm:$0xff]  ;;  %v6178_v35 = vld [vmem:[#allocation13_spill] sm:$0xff] }
  0xaa   :  { %3499 = vmatprep.subr.mxu1 %v1332_v16  ;;  %3510 = vmatprep.subr.mxu0 %v4603_v27  ;;  %v6176_v16 = vld [vmem:[#allocation11_spill] sm:$0xff]  ;;  %v6185_v45 = vld [vmem:[#allocation16_spill] sm:$0xff] }
  0xab   :  { %3500 = vmatpush3.msra.mxu1 %v1220_v43  ;;  %3511 = vmatpush3.msra.mxu0 %v4598_v60  ;;  %v6179_v43 = vld [vmem:[#allocation28_spill] sm:$0xff] }
  0xac   :  { %3501 = vmatprep.subr.mxu1 %v1339_v63  ;;  %3512 = vmatprep.subr.mxu0 %v4623_v23  ;;  %v6182_v63 = vld [vmem:[#allocation14_spill] sm:$0xff] }
  0xad   :  { %3502 = vmatpush3.msra.mxu1 %v1227_v32  ;;  %3513 = vmatpush3.msra.mxu0 %v4609_v12  ;;  %v6184_v32 = vld [vmem:[#allocation17_spill] sm:$0xff] }
  0xae   :  { %3503 = vmatprep.subr.mxu1 %v1346_v40  ;;  %3514 = vmatprep.subr.mxu0 %v4631_v34  ;;  %v6186_v40 = vld [vmem:[#allocation19_spill] sm:$0xff] }
  0xaf   :  { %3504 = vmatpush3.msra.mxu1 %v1234_v38  ;;  %3515 = vmatpush3.msra.mxu0 %v4620_v50  ;;  %v6187_v38 = vld [vmem:[#allocation18_spill] sm:$0xff] }
  0xb0   :  { %3505 = vmatprep.subr.mxu1 %v1353_v37  ;;  %3516 = vmatprep.subr.mxu0 %v4681_v9  ;;  %v6188_v37 = vld [vmem:[#allocation20_spill] sm:$0xff] }
  0xb1   :  { %3506 = vmatpush3.msra.mxu1 %v1241_v49  ;;  %1356 = vmatprep.mubr.f32.mxu1 %v4879_v36  ;;  %v6189_v49 = vld [vmem:[#allocation21_spill] sm:$0xff]  ;;  %v6193_v36 = vld [vmem:[#allocation32_spill] sm:$0xff] }
  0xb2   :  { %3517 = vmatpush3.msra.mxu0 %v4643_v14  ;;  %1358 = vmatmul.mubr.f32.vlgmr.msra.gmra.mxu1 %v4890_v26  ;;  %v6192_v26 = vld [vmem:[#allocation33_spill] sm:$0xff] }
  0xb3   :  { %3518 = vmatprep.subr.mxu0 %v4693_v22  ;;  %3545 = vmatprep.subr.mxu1 %v4575_v48 }
  0xb4   :  { %3519 = vmatpush3.msra.mxu0 %v4687_v6  ;;  %3546 = vmatpush3.msra.mxu1 %v4577_v11 }
  0xb5   :  { %3520 = vmatprep.subr.mxu0 %v4723_v42  ;;  %3547 = vmatprep.subr.mxu1 %v4590_v55 }
  0xb6   :  { %3521 = vmatpush3.msra.mxu0 %v4704_v18  ;;  %3548 = vmatpush3.msra.mxu1 %v4582_v15 }
  0xb7   :  { %3522 = vmatprep.subr.mxu0 %v4753_v58  ;;  %3549 = vmatprep.subr.mxu1 %v6174_v21 }
  0xb8   :  { %3523 = vmatpush3.msra.mxu0 %v6175_v28  ;;  %3550 = vmatpush3.msra.mxu1 %v6176_v16 }
  0xb9   :  { %3524 = vmatprep.subr.mxu0 %v6177_v24  ;;  %3551 = vmatprep.subr.mxu1 %v6178_v35 }
  0xba   :  { %3525 = vmatpush3.msra.mxu0 %v6179_v43  ;;  %3552 = vmatpush3.msra.mxu1 %v6180_v54 }
  0xbb   :  { %3526 = vmatprep.subr.mxu0 %v6181_v39  ;;  %3553 = vmatprep.subr.mxu1 %v6182_v63 }
  0xbc   :  { %3527 = vmatpush3.msra.mxu0 %v4808_v41  ;;  %3554 = vmatpush3.msra.mxu1 %v6183_v51 }
  0xbd   :  { %3528 = vmatprep.subr.mxu0 %v4862_v30  ;;  %3555 = vmatprep.subr.mxu1 %v6184_v32 }
  0xbe   :  { %3529 = vmatpush3.msra.mxu0 %v4824_v29  ;;  %3556 = vmatpush3.msra.mxu1 %v6185_v45 }
  0xbf   :  { %3530 = vmatprep.subr.mxu0 %v4888_v2  ;;  %3557 = vmatprep.subr.mxu1 %v6186_v40 }
  0xc0   :  { %3531 = vmatpush3.msra.mxu0 %v4847_v10  ;;  %3558 = vmatpush3.msra.mxu1 %v6187_v38 }
  0xc1   :  { %3532 = vmatprep.subr.mxu0 %v4910_v20  ;;  %3559 = vmatprep.subr.mxu1 %v6188_v37 }
  0xc2   :  { %3533 = vmatpush3.msra.mxu0 %v4857_v33  ;;  %3560 = vmatpush3.msra.mxu1 %v6189_v49  ;;  %v6194_v33 = vld [vmem:[#allocation24_spill] sm:$0xff] }
  0xc3   :  { %3534 = vmatprep.subr.mxu0 %v4942_v52  ;;  %3561 = vmatprep.subr.mxu1 %v6190_v61 }
  0xc4   :  { %3535 = vmatpush3.msra.mxu0 %v4918_v7  ;;  %3562 = vmatpush3.msra.mxu1 %v6191_v8 }
  0xc5   :  { %3536 = vmatprep.subr.mxu0 %v4961_v17  ;;  %3563 = vmatprep.subr.mxu1 %v6192_v26 }
  0xc6   :  { %3537 = vmatpush3.msra.mxu0 %v4928_v19  ;;  %3564 = vmatpush3.msra.mxu1 %v6193_v36 }
  0xc7   :  { %3538 = vmatprep.subr.mxu0 %v4975_v46  ;;  %3565 = vmatprep.subr.mxu1 %v6194_v33  ;;  %v6195_v33 = vand.u32 4294901760, %v4603_v27  ;;  %v6200_v27 = vand.u32 4294901760, %v4631_v34  ;;  %v6205_v34 = vand.u32 4294901760, %v4932_v4 }
  0xc8   :  { %3539 = vmatpush3.msra.mxu0 %v4979_v0  ;;  %3566 = vmatpush3.msra.mxu1 %v4802_v47  ;;  %v6196_v47 = vand.u32 4294901760, %v4598_v60  ;;  %v6201_v60 = vand.u32 4294901760, %v4620_v50  ;;  %v6207_v50 = vand.u32 4294901760, %v4687_v6  ;;  %v6211_v6 = vand.u32 4294901760, %v6175_v28 }
  0xc9   :  { %3540 = vmatprep.subr.mxu0 %v4994_v5  ;;  %3567 = vmatprep.subr.mxu1 %v4835_v44  ;;  %v6197_v5 = vld [vmem:[#allocation37_spill] sm:$0xff] }
  0xca   :  { %3541 = vmatpush3.msra.mxu0 %v4987_v1  ;;  %1493 = vmatprep.mubr.f32.mxu0 %v4921_v53  ;;  %v6198_v1 = vand.u32 4294901760, %v4623_v23  ;;  %v6202_v23 = vand.u32 4294901760, %v4681_v9  ;;  %v6208_v9 = vand.u32 4294901760, %v4723_v42  ;;  %v6214_v42 = vand.u32 4294901760, %v6181_v39 }
  0xcb   :  { %3568 = vmatpush3.msra.mxu1 %v4815_v62  ;;  %1496 = vmatmul.mubr.f32.vlgmr.msra.gmra.mxu0 %v4932_v4  ;;  %v6199_v62 = vand.u32 4294901760, %v4609_v12  ;;  %v6203_v12 = vand.u32 4294901760, %v4921_v53  ;;  %v142_v53 = vld [vmem:[#allocation5 + $0x2f0] sm:$0xff]  ;;  %v6220_v39 = vand.u32 4294901760, %v4847_v10  ;;  %v123_v10 = vld [vmem:[#allocation5 + $0x258] sm:$0xff] }
  0xcc   :  { %3569 = vmatprep.subr.mxu1 %v4897_v25  ;;  %3580 = vmatprep.subr.mxu0 %v6195_v33  ;;  %v6215_v33 = vand.u32 4294901760, %v4808_v41 }
  0xcd   :  { %3570 = vmatpush3.msra.mxu1 %v4877_v31  ;;  %3581 = vmatpush3.msra.mxu0 %v6196_v47  ;;  %v6206_v47 = vand.u32 4294901760, %v4693_v22  ;;  %v6210_v22 = vand.u32 4294901760, %v4753_v58  ;;  %v126_v58 = vld [vmem:[#allocation5 + $0x270] sm:$0xff] }
  0xce   :  { %3571 = vmatprep.subr.mxu1 %v6197_v5  ;;  %3582 = vmatprep.subr.mxu0 %v6198_v1  ;;  %v141_v1 = vld [vmem:[#allocation5 + $0x2e8] sm:$0xff]  ;;  %v5164_v28 = vand.u32 4294901760, %v126_v58 }
  0xcf   :  { %3572 = vmatpush3.msra.mxu1 %v4885_v59  ;;  %3583 = vmatpush3.msra.mxu0 %v6199_v62  ;;  %v6204_v62 = vand.u32 4294901760, %v4643_v14  ;;  %v6209_v14 = vand.u32 4294901760, %v4704_v18  ;;  %v6213_v18 = vand.u32 4294901760, %v6179_v43  ;;  %v124_v43 = vld [vmem:[#allocation5 + $0x260] sm:$0xff] }
  0xd0   :  { %3573 = vmatprep.subr.mxu1 %v4938_v56  ;;  %3584 = vmatprep.subr.mxu0 %v6200_v27 }
  0xd1   :  { %3574 = vmatpush3.msra.mxu1 %v4949_v13  ;;  %3585 = vmatpush3.msra.mxu0 %v6201_v60 }
  0xd2   :  { %3575 = vmatprep.subr.mxu1 %v4955_v3  ;;  %3586 = vmatprep.subr.mxu0 %v6202_v23 }
  0xd3   :  { %3576 = vmatpush3.msra.mxu1 %v4957_v57  ;;  %1600 = vmatprep.mubr.f32.mxu1 %v6203_v12 }
  0xd4   :  { %3587 = vmatpush3.msra.mxu0 %v6204_v62  ;;  %1604 = vmatmul.mubr.f32.vlgmr.msra.gmra.mxu1 %v6205_v34  ;;  %v6228_v62 = vand.u32 4294901760, %v4918_v7 }
  0xd5   :  { %3588 = vmatprep.subr.mxu0 %v6206_v47  ;;  %3615 = vmatprep.subr.mxu1 %v4575_v48  ;;  %v127_v48 = vld [vmem:[#allocation5 + $0x278] sm:$0xff]  ;;  %v5217_v47 = vand.u32 4294901760, %v123_v10 }
  0xd6   :  { %3589 = vmatpush3.msra.mxu0 %v6207_v50  ;;  %3616 = vmatpush3.msra.mxu1 %v4577_v11  ;;  %v6212_v11 = vand.u32 4294901760, %v6177_v24  ;;  %v6217_v24 = vand.u32 4294901760, %v4824_v29  ;;  %v122_v50 = vld [vmem:[#allocation5 + $0x250] sm:$0xff] }
  0xd7   :  { %3590 = vmatprep.subr.mxu0 %v6208_v9  ;;  %3617 = vmatprep.subr.mxu1 %v4590_v55  ;;  %v143_v55 = vld [vmem:[#allocation5 + $0x2f8] sm:$0xff]  ;;  %6229 = vst [vmem:[#allocation13_spill] sm:$0xff] %v5217_v47 }
  0xd8   :  { %3591 = vmatpush3.msra.mxu0 %v6209_v14  ;;  %3618 = vmatpush3.msra.mxu1 %v4582_v15  ;;  %v5151_v15 = vand.u32 4294901760, %v127_v48  ;;  %v5159_v4 = vand.u32 4294901760, %v143_v55  ;;  %v6232_v14 = vand.u32 4294901760, %v4928_v19  ;;  %v137_v19 = vld [vmem:[#allocation5 + $0x2c8] sm:$0xff] }
  0xd9   :  { %3592 = vmatprep.subr.mxu0 %v6210_v22  ;;  %3619 = vmatprep.subr.mxu1 %v6174_v21  ;;  %v6216_v21 = vand.u32 4294901760, %v4862_v30  ;;  %v5177_v30 = vand.u32 4294901760, %v141_v1 }
  0xda   :  { %3593 = vmatpush3.msra.mxu0 %v6211_v6  ;;  %3620 = vmatpush3.msra.mxu1 %v6176_v16  ;;  %v125_v16 = vld [vmem:[#allocation5 + $0x268] sm:$0xff]  ;;  %v5170_v41 = vsub.f32 %v127_v48, %v5151_v15  ;;  %v6233_v48 = vand.u32 4294901760, %v4975_v46  ;;  %v6234_v6 = vld [vmem:[#allocation24_spill] sm:$0xff] }
  0xdb   :  { %3594 = vmatprep.subr.mxu0 %v6212_v11  ;;  %3621 = vmatprep.subr.mxu1 %v6178_v35  ;;  %v5172_v35 = vand.u32 4294901760, %v142_v53  ;;  %6219 = vst [vmem:[#allocation12_spill] sm:$0xff] %v5177_v30  ;;  %v5182_v29 = vand.u32 4294901760, %v125_v16  ;;  %v5208_v12 = vsub.f32 %v141_v1, %v5177_v30 }
  0xdc   :  { %3595 = vmatpush3.msra.mxu0 %v6213_v18  ;;  %3622 = vmatpush3.msra.mxu1 %v6180_v54  ;;  %v6218_v54 = vand.u32 4294901760, %v4888_v2  ;;  %v5191_v2 = vsub.f32 %v126_v58, %v5164_v28  ;;  %v5965_v60 = vand.u32 4294901760, %v5170_v41  ;;  %v120_v58 = vld [vmem:[#allocation5 + $0x240] sm:$0xff] }
  0xdd   :  { %3596 = vmatprep.subr.mxu0 %v6214_v42  ;;  %3623 = vmatprep.subr.mxu1 %v6182_v63  ;;  %6221 = vst [vmem:[#allocation25_spill] sm:$0xff] %v5182_v29  ;;  %v140_v63 = vld [vmem:[#allocation5 + $0x2e0] sm:$0xff]  ;;  %v5200_v23 = vsub.f32 %v142_v53, %v5172_v35  ;;  %v6237_v42 = vand.u32 4294901760, %v4979_v0  ;;  %v6238_v53 = vld [vmem:[#allocation23_spill] sm:$0xff] }
  0xde   :  { %3597 = vmatpush3.msra.mxu0 %v6215_v33  ;;  %3624 = vmatpush3.msra.mxu1 %v6183_v51  ;;  %v5185_v51 = vsub.f32 %v143_v55, %v5159_v4  ;;  %v5234_v22 = vsub.f32 %v5170_v41, %v5965_v60  ;;  %v5242_v55 = vand.u32 4294901760, %v122_v50  ;;  %v5257_v33 = vsub.f32 %v123_v10, %v5217_v47  ;;  %v6244_v10 = vld [vmem:[#allocation35_spill] sm:$0xff] }
  0xdf   :  { %3598 = vmatprep.subr.mxu0 %v6216_v21  ;;  %3625 = vmatprep.subr.mxu1 %v6184_v32  ;;  %v6222_v32 = vand.u32 4294901760, %v4910_v20  ;;  %v6226_v20 = vand.u32 4294901760, %v4942_v52  ;;  %v138_v52 = vld [vmem:[#allocation5 + $0x2d0] sm:$0xff]  ;;  %v6239_v21 = vld [vmem:[#allocation39_spill] sm:$0xff] }
  0xe0   :  { %3599 = vmatpush3.msra.mxu0 %v6217_v24  ;;  %3626 = vmatpush3.msra.mxu1 %v6185_v45  ;;  %v5193_v45 = vand.u32 4294901760, %v124_v43  ;;  %v5966_v34 = vand.u32 4294901760, %v5185_v51  ;;  %v5240_v11 = vand.u32 4294901760, %v138_v52  ;;  %6236 = vst [vmem:[#allocation30_spill] sm:$0xff] %v5242_v55 }
  0xe1   :  { %3600 = vmatprep.subr.mxu0 %v6218_v54  ;;  %3627 = vmatprep.subr.mxu1 %v6186_v40  ;;  %v6224_v40 = vld [vmem:[#allocation31_spill] sm:$0xff] }
  0xe2   :  { %3601 = vmatpush3.msra.mxu0 %v6220_v39  ;;  %3628 = vmatpush3.msra.mxu1 %v6187_v38  ;;  %6223 = vst [vmem:[#allocation11_spill] sm:$0xff] %v5193_v45  ;;  %v6225_v27 = vand.u32 4294901760, %v6224_v40  ;;  %v139_v38 = vld [vmem:[#allocation5 + $0x2d8] sm:$0xff]  ;;  %v5223_v9 = vsub.f32 %v124_v43, %v5193_v45  ;;  %6235 = vst [vmem:[#allocation29_spill] sm:$0xff] %v5240_v11  ;;  %v5254_v46 = vsub.f32 %v5185_v51, %v5966_v34  ;;  %v136_v43 = vld [vmem:[#allocation5 + $0x2c0] sm:$0xff] }
  0xe3   :  { %3602 = vmatprep.subr.mxu0 %v6222_v32  ;;  %3629 = vmatprep.subr.mxu1 %v6188_v37  ;;  %v5205_v37 = vand.u32 4294901760, %v140_v63  ;;  %v5225_v7 = vand.u32 4294901760, %v139_v38 }
  0xe4   :  { %3603 = vmatpush3.msra.mxu0 %v6225_v27  ;;  %3630 = vmatpush3.msra.mxu1 %v6189_v49  ;;  %v5214_v49 = vsub.f32 %v125_v16, %v5182_v29  ;;  %v6240_v16 = vand.u32 4294901760, %v6239_v21  ;;  %v5961_v54 = vand.u32 4294901760, %v5223_v9  ;;  %v5283_v27 = vand.u32 4294901760, %v137_v19 }
  0xe5   :  { %3604 = vmatprep.subr.mxu0 %v6226_v20  ;;  %3631 = vmatprep.subr.mxu1 %v6190_v61  ;;  %6227 = vst [vmem:[#allocation22_spill] sm:$0xff] %v5205_v37  ;;  %v6230_v61 = vand.u32 4294901760, %v4961_v17  ;;  %6231 = vst [vmem:[#allocation28_spill] sm:$0xff] %v5225_v7  ;;  %v5963_v17 = vand.u32 4294901760, %v5200_v23  ;;  %v5246_v18 = vsub.f32 %v140_v63, %v5205_v37  ;;  %v6242_v63 = vld [vmem:[#allocation38_spill] sm:$0xff]  ;;  %v5285_v20 = vand.u32 4294901760, %v120_v58 }
  0xe6   :  { %3605 = vmatpush3.msra.mxu0 %v6228_v62  ;;  %3632 = vmatpush3.msra.mxu1 %v6191_v8  ;;  %v5962_v8 = vand.u32 4294901760, %v5191_v2  ;;  %v5959_v1 = vand.u32 4294901760, %v5214_v49  ;;  %v5272_v39 = vsub.f32 %v139_v38, %v5225_v7  ;;  %v6243_v32 = vand.u32 4294901760, %v6242_v63  ;;  %6245 = vst [vmem:[#allocation15_spill] sm:$0xff] %v5283_v27  ;;  %v6247_v62 = vld [vmem:[#allocation34_spill] sm:$0xff]  ;;  %v6248_v38 = vld [vmem:[#allocation36_spill] sm:$0xff] }
  0xe7   :  { %3606 = vmatprep.subr.mxu0 %v6230_v61  ;;  %3633 = vmatprep.subr.mxu1 %v6192_v26  ;;  %v121_v26 = vld [vmem:[#allocation5 + $0x248] sm:$0xff]  ;;  %v5281_v40 = vsub.f32 %v5200_v23, %v5963_v17  ;;  %6246 = vst [vmem:[#allocation17_spill] sm:$0xff] %v5285_v20  ;;  %v5290_v61 = vsub.f32 %v122_v50, %v5242_v55  ;;  %v5309_v21 = vand.u32 4294901760, %v136_v43  ;;  %v135_v63 = vld [vmem:[#allocation5 + $0x2b8] sm:$0xff] }
  0xe8   :  { %3607 = vmatpush3.msra.mxu0 %v6232_v14  ;;  %3634 = vmatpush3.msra.mxu1 %v6193_v36  ;;  %v5960_v36 = vand.u32 4294901760, %v5208_v12  ;;  %v5266_v0 = vsub.f32 %v5191_v2, %v5962_v8  ;;  %v5268_v24 = vand.u32 4294901760, %v121_v26  ;;  %v5307_v50 = vsub.f32 %v5214_v49, %v5959_v1 }
  0xe9   :  { %3608 = vmatprep.subr.mxu0 %v6233_v48  ;;  %3635 = vmatprep.subr.mxu1 %v6234_v6  ;;  %v5964_v48 = vand.u32 4294901760, %v5246_v18  ;;  %v119_v6 = vld [vmem:[#allocation5 + $0x238] sm:$0xff]  ;;  %6249 = vst [vmem:[#allocation16_spill] sm:$0xff] %v5309_v21  ;;  %v5970_v8 = vand.u32 4294901760, %v5290_v61  ;;  %v5356_v60 = vsub.f32 %v136_v43, %v5309_v21 }
  0xea   :  { %3609 = vmatpush3.msra.mxu0 %v6237_v42  ;;  %3636 = vmatpush3.msra.mxu1 %v6238_v53  ;;  %6241 = vst [vmem:[#allocation14_spill] sm:$0xff] %v5268_v24  ;;  %v5295_v14 = vsub.f32 %v5208_v12, %v5960_v36  ;;  %v5299_v42 = vsub.f32 %v138_v52, %v5240_v11  ;;  %v2110_v53 = vand.u32 4294901760, %v5254_v46  ;;  %v5330_v1 = vand.u32 4294901760, %v119_v6  ;;  %v116_v52 = vld [vmem:[#allocation5 + $0x220] sm:$0xff] }
  0xeb   :  { %3610 = vmatprep.subr.mxu0 %v6240_v16  ;;  %3637 = vmatprep.subr.mxu1 %v4835_v44  ;;  %v5967_v16 = vand.u32 4294901760, %v5257_v33  ;;  %v5321_v46 = vsub.f32 %v5223_v9, %v5961_v54  ;;  %v5333_v36 = vsub.f32 %v137_v19, %v5283_v27  ;;  %v5348_v19 = vand.u32 4294901760, %v135_v63  ;;  %6254 = vst [vmem:[#allocation26_spill] sm:$0xff] %v5356_v60  ;;  %v133_v54 = vld [vmem:[#allocation5 + $0x2a8] sm:$0xff] }
  0xec   :  { %3611 = vmatpush3.msra.mxu0 %v6243_v32  ;;  %1770 = vmatprep.mubr.f32.mxu0 %v6244_v10  ;;  %v5968_v32 = vand.u32 4294901760, %v5272_v39  ;;  %6252 = vst [vmem:[#allocation20_spill] sm:$0xff] %v5330_v1 }
  0xed   :  { %3638 = vmatpush3.msra.mxu1 %v6247_v62  ;;  %1772 = vmatmul.mubr.f32.vlgmr.msra.gmra.mxu0 %v6248_v38  ;;  %v5328_v62 = vsub.f32 %v120_v58, %v5285_v20  ;;  %v5969_v58 = vand.u32 4294901760, %v5299_v42  ;;  %6253 = vst [vmem:[#allocation21_spill] sm:$0xff] %v5348_v19  ;;  %v5353_v17 = vsub.f32 %v5257_v33, %v5967_v16 }
  0xee   :  { %3639 = vmatprep.subr.mxu1 %v4897_v25  ;;  %3650 = vmatprep.subr.mxu0 %v5159_v4  ;;  %v5316_v25 = vsub.f32 %v121_v26, %v5268_v24  ;;  %v118_v26 = vld [vmem:[#allocation5 + $0x230] sm:$0xff]  ;;  %v5364_v34 = vsub.f32 %v5272_v39, %v5968_v32 }
  0xef   :  { %3640 = vmatpush3.msra.mxu1 %v4877_v31  ;;  %3651 = vmatpush3.msra.mxu0 %v5151_v15  ;;  %v2117_v31 = vand.u32 4294901760, %v5281_v40  ;;  %6251 = vst [vmem:[#allocation18_spill] sm:$0xff] %v5328_v62  ;;  %v134_v40 = vld [vmem:[#allocation5 + $0x2b0] sm:$0xff] }
  0xf0   :  { %6250 = vst [vmem:[#allocation19_spill] sm:$0xff] %v5316_v25  ;;  %3641 = vmatprep.subr.mxu1 %v6197_v5  ;;  %3652 = vmatprep.subr.mxu0 %v5172_v35  ;;  %v5341_v5 = vsub.f32 %v5246_v18, %v5964_v48  ;;  %v117_v48 = vld [vmem:[#allocation5 + $0x228] sm:$0xff]  ;;  %v5374_v43 = vand.u32 4294901760, %v134_v40 }
  0xf1   :  { %3642 = vmatpush3.msra.mxu1 %v4885_v59  ;;  %3653 = vmatpush3.msra.mxu0 %v5164_v28  ;;  %v5366_v59 = vand.u32 4294901760, %v118_v26  ;;  %v5391_v16 = vand.u32 4294901760, %v117_v48 }
  0xf2   :  { %3643 = vmatprep.subr.mxu1 %v4938_v56  ;;  %3654 = vmatprep.subr.mxu0 %v5177_v30  ;;  %6257 = vst [vmem:[#allocation32_spill] sm:$0xff] %v5374_v43  ;;  %v2131_v44 = vand.u32 4294901760, %v5341_v5  ;;  %v132_v56 = vld [vmem:[#allocation5 + $0x2a0] sm:$0xff]  ;;  %v46_v5 = vld [vmem:[#allocation2 + $0x28] sm:$0xff]  ;;  %v5437_v30 = vsub.f32 %v134_v40, %v5374_v43  ;;  %v6268_v40 = vand.u32 4294901760, %v5295_v14 }
  0xf3   :  { %3644 = vmatpush3.msra.mxu1 %v4949_v13  ;;  %3655 = vmatpush3.msra.mxu0 %v5182_v29  ;;  %6255 = vst [vmem:[#allocation27_spill] sm:$0xff] %v5366_v59  ;;  %v5372_v13 = vsub.f32 %v119_v6, %v5330_v1  ;;  %v5389_v6 = vsub.f32 %v5290_v61, %v5970_v8  ;;  %6258 = vst [vmem:[#allocation37_spill] sm:$0xff] %v5391_v16  ;;  %v2138_v8 = vand.u32 4294901760, %v5364_v34 }
  0xf4   :  { %3645 = vmatprep.subr.mxu1 %v4955_v3  ;;  %3656 = vmatprep.subr.mxu0 %v5205_v37  ;;  %v5384_v3 = vsub.f32 %v5299_v42, %v5969_v58  ;;  %v5399_v58 = vand.u32 4294901760, %v116_v52  ;;  %v5404_v32 = vsub.f32 %v118_v26, %v5366_v59  ;;  %v115_v37 = vld [vmem:[#allocation5 + $0x218] sm:$0xff]  ;;  %v6263_v34 = vand.u32 4294901760, %v5333_v36 }
  0xf5   :  { %6256 = vst [vmem:[#allocation33_spill] sm:$0xff] %v5372_v13  ;;  %3646 = vmatpush3.msra.mxu1 %v4957_v57  ;;  %1874 = vmatprep.mubr.f32.mxu1 %v6244_v10  ;;  %v5396_v10 = vand.u32 4294901760, %v133_v54  ;;  %v5412_v57 = vsub.f32 %v135_v63, %v5348_v19  ;;  %v5422_v26 = vand.u32 4294901760, %v132_v56  ;;  %v6266_v63 = vand.u32 4294901760, %v5356_v60 }
  0xf6   :  { %3657 = vmatpush3.msra.mxu0 %v5193_v45  ;;  %1876 = vmatmul.mubr.f32.vlgmr.msra.gmra.mxu1 %v6248_v38  ;;  %6260 = vst [vmem:[#allocation24_spill] sm:$0xff] %v5399_v58  ;;  %v6261_v45 = vand.u32 4294901760, %v5316_v25 }
  0xf7   :  { %6259 = vst [vmem:[#allocation31_spill] sm:$0xff] %v5396_v10  ;;  %3658 = vmatprep.subr.mxu0 %v5225_v7  ;;  %3685 = vmatprep.subr.mxu1 %v2110_v53  ;;  %v6262_v7 = vand.u32 4294901760, %v5234_v22  ;;  %v5420_v53 = vsub.f32 %v5333_v36, %v6263_v34  ;;  %v2033_v22 = vand.u32 4294901760, %v5389_v6  ;;  %v5434_v34 = vsub.f32 %v117_v48, %v5391_v16  ;;  %v114_v48 = vld [vmem:[#allocation5 + $0x210] sm:$0xff] }
  0xf8   :  { %v5409_v38 = vsub.f32 %v5316_v25, %v6261_v45  ;;  %3659 = vmatpush3.msra.mxu0 %v5217_v47  ;;  %v6264_v45 = vand.u32 4294901760, %v5328_v62  ;;  %v45_v25 = vld [vmem:[#allocation2 + $0x20] sm:$0xff]  ;;  %v131_v47 = vld [vmem:[#allocation5 + $0x298] sm:$0xff]  ;;  %v5450_v6 = vand.u32 4294901760, %v115_v37 }
  0xf9   :  { %3686 = vmatpush3.msra.mxu1 %v6262_v7  ;;  %3660 = vmatprep.subr.mxu0 %v5240_v11  ;;  %v2145_v7 = vand.u32 4294901760, %v5384_v3  ;;  %v5448_v3 = vsub.f32 %v116_v52, %v5399_v58  ;;  %v5452_v11 = vand.u32 4294901760, %v46_v5  ;;  %v5462_v52 = vand.u32 4294901760, %v45_v25 }
  0xfa   :  { %v5427_v29 = vsub.f32 %v5328_v62, %v6264_v45  ;;  %3687 = vmatprep.subr.mxu1 %v2117_v31  ;;  %3661 = vmatpush3.msra.mxu0 %v5242_v55  ;;  %v6265_v45 = vand.u32 4294901760, %v5266_v0  ;;  %v5445_v31 = vsub.f32 %v5356_v60, %v6266_v63  ;;  %v2040_v0 = vand.u32 4294901760, %v5409_v38  ;;  %v130_v55 = vld [vmem:[#allocation5 + $0x290] sm:$0xff] }
  0xfb   :  { %6267 = vst [vmem:[#allocation23_spill] sm:$0xff] %v5452_v11  ;;  %3662 = vmatprep.subr.mxu0 %v5283_v27  ;;  %v5460_v63 = vsub.f32 %v133_v54, %v5396_v10  ;;  %6269 = vst [vmem:[#allocation39_spill] sm:$0xff] %v5462_v52  ;;  %v6270_v62 = vand.u32 4294901760, %v5307_v50  ;;  %v2152_v27 = vand.u32 4294901760, %v5420_v53  ;;  %v6271_v38 = vand.u32 4294901760, %v5372_v13  ;;  %v129_v54 = vld [vmem:[#allocation5 + $0x288] sm:$0xff]  ;;  %2218 = vmatprep.mubr.f32.mxu1 %v5452_v11 }
  0xfc   :  { %3688 = vmatpush3.msra.mxu1 %v6265_v45  ;;  %3663 = vmatpush3.msra.mxu0 %v5268_v24  ;;  %v2047_v14 = vand.u32 4294901760, %v5427_v29  ;;  %v5478_v60 = vand.u32 4294901760, %v114_v48  ;;  %v5482_v29 = vsub.f32 %v132_v56, %v5422_v26  ;;  %v6272_v53 = vand.u32 4294901760, %v5321_v46 }
  0xfd   :  { %3689 = vmatprep.subr.mxu1 %v6268_v40  ;;  %v5469_v40 = vand.u32 4294901760, %v131_v47  ;;  %v5474_v45 = vsub.f32 %v5372_v13, %v6271_v38  ;;  %3664 = vmatprep.subr.mxu0 %v5309_v21  ;;  %v2159_v38 = vand.u32 4294901760, %v5445_v31  ;;  %v5489_v21 = vsub.f32 %v115_v37, %v5450_v6  ;;  %v128_v31 = vld [vmem:[#allocation5 + $0x280] sm:$0xff] }
  0xfe   :  { %3690 = vmatpush3.msra.mxu1 %v6270_v62  ;;  %v113_v62 = vld [vmem:[#allocation5 + $0x208] sm:$0xff]  ;;  %3665 = vmatpush3.msra.mxu0 %v5285_v20  ;;  %v5494_v24 = vsub.f32 %v46_v5, %v5452_v11  ;;  %v6274_v56 = vand.u32 4294901760, %v5412_v57  ;;  %v5500_v20 = vand.u32 4294901760, %v129_v54  ;;  %v5504_v37 = vsub.f32 %v45_v25, %v5462_v52  ;;  %v6311_v11 = vld [vmem:[#allocation31_spill] sm:$0xff] }
  0xff   :  { %3691 = vmatprep.subr.mxu1 %v2131_v44  ;;  %v5491_v44 = vand.u32 4294901760, %v130_v55  ;;  %3666 = vmatprep.subr.mxu0 %v5348_v19  ;;  %v6275_v5 = vand.u32 4294901760, %v5353_v17  ;;  %v5510_v19 = vand.u32 4294901760, %v113_v62  ;;  %v5514_v13 = vsub.f32 %v131_v47, %v5469_v40 }
 0x100   :  { %3692 = vmatpush3.msra.mxu1 %v6272_v53  ;;  %v2165_v50 = vsub.f32 %v5412_v57, %v6274_v56  ;;  %v112_v53 = vld [vmem:[#allocation5 + $0x200] sm:$0xff]  ;;  %3667 = vmatpush3.msra.mxu0 %v5330_v1  ;;  %v6276_v25 = vand.u32 4294901760, %v5437_v30  ;;  %v5521_v1 = vsub.f32 %v114_v48, %v5478_v60  ;;  %v6277_v17 = vand.u32 4294901760, %v5404_v32 }
 0x101   :  { %6273 = vst [vmem:[#allocation38_spill] sm:$0xff] %v5491_v44  ;;  %3693 = vmatprep.subr.mxu1 %v2138_v8  ;;  %v2054_v8 = vand.u32 4294901760, %v5474_v45  ;;  %3668 = vmatprep.subr.mxu0 %v5374_v43  ;;  %v5528_v47 = vand.u32 4294901760, %v128_v31  ;;  %v5530_v56 = vand.u32 4294901760, %v112_v53 }
 0x102   :  { %3694 = vmatpush3.msra.mxu1 %v6275_v5  ;;  %v2172_v46 = vsub.f32 %v5437_v30, %v6276_v25  ;;  %v2060_v45 = vsub.f32 %v5404_v32, %v6277_v17  ;;  %3669 = vmatpush3.msra.mxu0 %v5366_v59  ;;  %v5534_v25 = vsub.f32 %v130_v55, %v5491_v44  ;;  %v2166_v48 = vand.u32 4294901760, %v2165_v50 }
 0x103   :  { %3695 = vmatprep.subr.mxu1 %v2145_v7  ;;  %3670 = vmatprep.subr.mxu0 %v5396_v10  ;;  %v6278_v17 = vand.u32 4294901760, %v5460_v63  ;;  %v5544_v7 = vsub.f32 %v113_v62, %v5510_v19  ;;  %v6279_v55 = vand.u32 4294901760, %v5434_v34  ;;  %v5551_v50 = vsub.f32 %v129_v54, %v5500_v20 }
 0x104   :  { %3696 = vmatpush3.msra.mxu1 %v2033_v22  ;;  %3671 = vmatpush3.msra.mxu0 %v5391_v16  ;;  %v2061_v22 = vand.u32 4294901760, %v2060_v45  ;;  %v6280_v59 = vand.u32 4294901760, %v5482_v29  ;;  %v6282_v54 = vand.u32 4294901760, %v5494_v24  ;;  %v6284_v45 = vand.u32 4294901760, %v5448_v3 }
 0x105   :  { %3697 = vmatprep.subr.mxu1 %v2152_v27  ;;  %v2179_v5 = vsub.f32 %v5460_v63, %v6278_v17  ;;  %v2067_v10 = vsub.f32 %v5434_v34, %v6279_v55  ;;  %3672 = vmatprep.subr.mxu0 %v5422_v26  ;;  %v2173_v17 = vand.u32 4294901760, %v2172_v46  ;;  %v5560_v55 = vsub.f32 %v112_v53, %v5530_v56 }
 0x106   :  { %3698 = vmatpush3.msra.mxu1 %v2040_v0  ;;  %v2186_v0 = vsub.f32 %v5482_v29, %v6280_v59  ;;  %3673 = vmatpush3.msra.mxu0 %v5399_v58  ;;  %v1980_v27 = vsub.f32 %v5494_v24, %v6282_v54  ;;  %v5567_v46 = vsub.f32 %v128_v31, %v5528_v47  ;;  %v6285_v53 = vand.u32 4294901760, %v5504_v37 }
 0x107   :  { %3699 = vmatprep.subr.mxu1 %v2159_v38  ;;  %6281 = vst [vmem:[#allocation35_spill] sm:$0xff] %v5560_v55  ;;  %3674 = vmatprep.subr.mxu0 %v5469_v40  ;;  %v2180_v59 = vand.u32 4294901760, %v2179_v5  ;;  %v2068_v54 = vand.u32 4294901760, %v2067_v10  ;;  %v6286_v31 = vand.u32 4294901760, %v5514_v13  ;;  %v6015_v58 = vand.u32 4294901760, %v5560_v55 }
 0x108   :  { %3700 = vmatpush3.msra.mxu1 %v2047_v14  ;;  %6283 = vst [vmem:[#allocation34_spill] sm:$0xff] %v5567_v46  ;;  %v2074_v14 = vsub.f32 %v5448_v3, %v6284_v45  ;;  %v1986_v62 = vsub.f32 %v5504_v37, %v6285_v53  ;;  %3675 = vmatpush3.msra.mxu0 %v5450_v6  ;;  %v6287_v45 = vand.u32 4294901760, %v5489_v21  ;;  %v1981_v10 = vand.u32 4294901760, %v1980_v27 }
 0x109   :  { %3701 = vmatprep.subr.mxu1 %v2166_v48  ;;  %v2193_v38 = vsub.f32 %v5514_v13, %v6286_v31  ;;  %3676 = vmatprep.subr.mxu0 %v5491_v44  ;;  %v2187_v48 = vand.u32 4294901760, %v2186_v0  ;;  %v6016_v5 = vand.u32 4294901760, %v5567_v46  ;;  %v6289_v44 = vand.u32 4294901760, %v5521_v1 }
 0x10a   :  { %3702 = vmatpush3.msra.mxu1 %v2054_v8  ;;  %v2081_v53 = vsub.f32 %v5489_v21, %v6287_v45  ;;  %3677 = vmatpush3.msra.mxu0 %v5478_v60  ;;  %v6288_v8 = vand.u32 4294901760, %v5534_v25  ;;  %v1987_v0 = vand.u32 4294901760, %v1986_v62  ;;  %v6290_v27 = vand.u32 4294901760, %v5551_v50 }
 0x10b   :  { %3703 = vmatprep.subr.mxu1 %v2173_v17  ;;  %3678 = vmatprep.subr.mxu0 %v5500_v20  ;;  %v2075_v17 = vand.u32 4294901760, %v2074_v14  ;;  %v2088_v45 = vsub.f32 %v5521_v1, %v6289_v44  ;;  %v6291_v62 = vand.u32 4294901760, %v5544_v7 }
 0x10c   :  { %3704 = vmatpush3.msra.mxu1 %v2061_v22  ;;  %v2200_v31 = vsub.f32 %v5534_v25, %v6288_v8  ;;  %3679 = vmatpush3.msra.mxu0 %v5510_v19  ;;  %v2194_v22 = vand.u32 4294901760, %v2193_v38  ;;  %v2207_v8 = vsub.f32 %v5551_v50, %v6290_v27  ;;  %v2214_v38 = vsub.f32 %v5567_v46, %v6016_v5  ;;  %v6295_v27 = vld [vmem:[#allocation26_spill] sm:$0xff]  ;;  %v6309_v5 = vld [vmem:[#allocation20_spill] sm:$0xff] }
 0x10d   :  { %3705 = vmatprep.subr.mxu1 %v2180_v59  ;;  %3680 = vmatprep.subr.mxu0 %v5528_v47  ;;  %v2082_v59 = vand.u32 4294901760, %v2081_v53  ;;  %v2095_v14 = vsub.f32 %v5544_v7, %v6291_v62  ;;  %v6298_v62 = vld [vmem:[#allocation11_spill] sm:$0xff] }
 0x10e   :  { %3706 = vmatpush3.msra.mxu1 %v2068_v54  ;;  %3681 = vmatpush3.msra.mxu0 %v5530_v56  ;;  %v2201_v44 = vand.u32 4294901760, %v2200_v31  ;;  %v2089_v54 = vand.u32 4294901760, %v2088_v45  ;;  %v2208_v53 = vand.u32 4294901760, %v2207_v8  ;;  %v2215_v31 = vand.u32 4294901760, %v2214_v38  ;;  %v6293_v45 = vld [vmem:[#allocation19_spill] sm:$0xff]  ;;  %v6296_v8 = vld [vmem:[#allocation22_spill] sm:$0xff] }
 0x10f   :  { %3707 = vmatprep.subr.mxu1 %v2187_v48  ;;  %1982 = vmatprep.mubr.f32.mxu0 %v1981_v10  ;;  %v2102_v48 = vsub.f32 %v5560_v55, %v6015_v58  ;;  %v2096_v10 = vand.u32 4294901760, %v2095_v14  ;;  %v6299_v14 = vld [vmem:[#allocation28_spill] sm:$0xff]  ;;  %v6301_v38 = vld [vmem:[#allocation13_spill] sm:$0xff] }
 0x110   :  { %3708 = vmatpush3.msra.mxu1 %v2075_v17  ;;  %1988 = vmatmul.mubr.f32.vlgmr.msra.gmra.mxu0 %v1987_v0  ;;  %v6292_v0 = vld [vmem:[#allocation12_spill] sm:$0xff]  ;;  %v6308_v58 = vld [vmem:[#allocation21_spill] sm:$0xff] }
 0x111   :  { %3709 = vmatprep.subr.mxu1 %v2194_v22  ;;  %3720 = vmatprep.subr.mxu0 %v5185_v51  ;;  %v2103_v17 = vand.u32 4294901760, %v2102_v48  ;;  %v6294_v22 = vld [vmem:[#allocation25_spill] sm:$0xff]  ;;  %v6303_v48 = vld [vmem:[#allocation30_spill] sm:$0xff] }
 0x112   :  { %3710 = vmatpush3.msra.mxu1 %v2082_v59  ;;  %3721 = vmatpush3.msra.mxu0 %v5170_v41  ;;  %v6297_v59 = vld [vmem:[#allocation18_spill] sm:$0xff] }
 0x113   :  { %3711 = vmatprep.subr.mxu1 %v2201_v44  ;;  %3722 = vmatprep.subr.mxu0 %v5200_v23  ;;  %v6300_v44 = vld [vmem:[#allocation33_spill] sm:$0xff] }
 0x114   :  { %3712 = vmatpush3.msra.mxu1 %v2089_v54  ;;  %3723 = vmatpush3.msra.mxu0 %v5191_v2  ;;  %v6302_v54 = vld [vmem:[#allocation29_spill] sm:$0xff] }
 0x115   :  { %3713 = vmatprep.subr.mxu1 %v2208_v53  ;;  %3724 = vmatprep.subr.mxu0 %v5208_v12  ;;  %v6304_v53 = vld [vmem:[#allocation15_spill] sm:$0xff] }
 0x116   :  { %3714 = vmatpush3.msra.mxu1 %v2096_v10  ;;  %3725 = vmatpush3.msra.mxu0 %v5214_v49  ;;  %v6305_v10 = vld [vmem:[#allocation14_spill] sm:$0xff] }
 0x117   :  { %3715 = vmatprep.subr.mxu1 %v2215_v31  ;;  %3726 = vmatprep.subr.mxu0 %v5246_v18  ;;  %v6306_v31 = vld [vmem:[#allocation16_spill] sm:$0xff] }
 0x118   :  { %3716 = vmatpush3.msra.mxu1 %v2103_v17  ;;  %3727 = vmatpush3.msra.mxu0 %v5223_v9  ;;  %v6307_v17 = vld [vmem:[#allocation17_spill] sm:$0xff] }
 0x119   :  { %2220 = vmatmul.mubr.f32.vlgmr.msra.gmra.mxu1 %v5462_v52  ;;  %3728 = vmatprep.subr.mxu0 %v5272_v39  ;;  %v6310_v52 = vld [vmem:[#allocation27_spill] sm:$0xff] }
 0x11a   :  { %3755 = vmatprep.subr.mxu1 %v5159_v4  ;;  %3729 = vmatpush3.msra.mxu0 %v5257_v33 }
 0x11b   :  { %3756 = vmatpush3.msra.mxu1 %v5151_v15  ;;  %3730 = vmatprep.subr.mxu0 %v5299_v42 }
 0x11c   :  { %3757 = vmatprep.subr.mxu1 %v5172_v35  ;;  %3731 = vmatpush3.msra.mxu0 %v5290_v61 }
 0x11d   :  { %3758 = vmatpush3.msra.mxu1 %v5164_v28  ;;  %3732 = vmatprep.subr.mxu0 %v5333_v36 }
 0x11e   :  { %3759 = vmatprep.subr.mxu1 %v6292_v0  ;;  %3733 = vmatpush3.msra.mxu0 %v6293_v45 }
 0x11f   :  { %3760 = vmatpush3.msra.mxu1 %v6294_v22  ;;  %3734 = vmatprep.subr.mxu0 %v6295_v27 }
 0x120   :  { %3761 = vmatprep.subr.mxu1 %v6296_v8  ;;  %3735 = vmatpush3.msra.mxu0 %v6297_v59 }
 0x121   :  { %3762 = vmatpush3.msra.mxu1 %v6298_v62  ;;  %3736 = vmatprep.subr.mxu0 %v5412_v57 }
 0x122   :  { %3763 = vmatprep.subr.mxu1 %v6299_v14  ;;  %3737 = vmatpush3.msra.mxu0 %v6300_v44 }
 0x123   :  { %3764 = vmatpush3.msra.mxu1 %v6301_v38  ;;  %3738 = vmatprep.subr.mxu0 %v5437_v30 }
 0x124   :  { %3765 = vmatprep.subr.mxu1 %v6302_v54  ;;  %3739 = vmatpush3.msra.mxu0 %v5404_v32 }
 0x125   :  { %3766 = vmatpush3.msra.mxu1 %v6303_v48  ;;  %3740 = vmatprep.subr.mxu0 %v5460_v63 }
 0x126   :  { %3767 = vmatprep.subr.mxu1 %v6304_v53  ;;  %3741 = vmatpush3.msra.mxu0 %v5434_v34 }
 0x127   :  { %3768 = vmatpush3.msra.mxu1 %v6305_v10  ;;  %3742 = vmatprep.subr.mxu0 %v5482_v29 }
 0x128   :  { %3769 = vmatprep.subr.mxu1 %v6306_v31  ;;  %3743 = vmatpush3.msra.mxu0 %v5448_v3 }
 0x129   :  { %3770 = vmatpush3.msra.mxu1 %v6307_v17  ;;  %3744 = vmatprep.subr.mxu0 %v5514_v13 }
 0x12a   :  { %3771 = vmatprep.subr.mxu1 %v6308_v58  ;;  %3745 = vmatpush3.msra.mxu0 %v5489_v21 }
 0x12b   :  { %3772 = vmatpush3.msra.mxu1 %v6309_v5  ;;  %3746 = vmatprep.subr.mxu0 %v5534_v25 }
 0x12c   :  { %3773 = vmatprep.subr.mxu1 %v5374_v43  ;;  %3747 = vmatpush3.msra.mxu0 %v5521_v1  ;;  %v6312_v43 = vld [vmem:[#allocation24_spill] sm:$0xff] }
 0x12d   :  { %3774 = vmatpush3.msra.mxu1 %v6310_v52  ;;  %3748 = vmatprep.subr.mxu0 %v5551_v50 }
 0x12e   :  { %3775 = vmatprep.subr.mxu1 %v6311_v11  ;;  %3749 = vmatpush3.msra.mxu0 %v5544_v7  ;;  %v6313_v11 = vand.u32 4294901760, %v5185_v51  ;;  %v6318_v51 = vand.u32 4294901760, %v5208_v12  ;;  %v6323_v12 = vand.u32 4294901760, %v5504_v37 }
 0x12f   :  { %3776 = vmatpush3.msra.mxu1 %v5391_v16  ;;  %3750 = vmatprep.subr.mxu0 %v5567_v46  ;;  %v6314_v16 = vand.u32 4294901760, %v5170_v41  ;;  %v6315_v46 = vld [vmem:[#allocation38_spill] sm:$0xff]  ;;  %v6319_v41 = vand.u32 4294901760, %v5214_v49  ;;  %v6325_v49 = vand.u32 4294901760, %v5257_v33  ;;  %v6330_v33 = vand.u32 4294901760, %v6295_v27  ;;  %v6343_v27 = vld [vmem:[#allocation32_spill] sm:$0xff] }
 0x130   :  { %3777 = vmatprep.subr.mxu1 %v5422_v26  ;;  %3751 = vmatpush3.msra.mxu0 %v5560_v55  ;;  %v6316_v55 = vand.u32 4294901760, %v5200_v23  ;;  %v6320_v23 = vand.u32 4294901760, %v5246_v18  ;;  %v6326_v18 = vand.u32 4294901760, %v5299_v42  ;;  %v6335_v42 = vand.u32 4294901760, %v5404_v32 }
 0x131   :  { %2355 = vmatprep.mubr.f32.mxu0 %v5494_v24  ;;  %3778 = vmatpush3.msra.mxu1 %v6312_v43  ;;  %v6317_v43 = vand.u32 4294901760, %v5191_v2  ;;  %v6321_v2 = vand.u32 4294901760, %v5494_v24  ;;  %v6328_v24 = vand.u32 4294901760, %v5333_v36 }
 0x132   :  { %2358 = vmatmul.mubr.f32.vlgmr.msra.gmra.mxu0 %v5504_v37  ;;  %3779 = vmatprep.subr.mxu1 %v5469_v40  ;;  %v6336_v37 = vand.u32 4294901760, %v5460_v63 }
 0x133   :  { %3790 = vmatprep.subr.mxu0 %v6313_v11  ;;  %3780 = vmatpush3.msra.mxu1 %v5450_v6  ;;  %v6322_v11 = vand.u32 4294901760, %v5223_v9  ;;  %v6327_v9 = vand.u32 4294901760, %v5290_v61  ;;  %v6334_v61 = vand.u32 4294901760, %v5437_v30  ;;  %v144_v30 = vld [vmem:[#allocation5 + $0x300] sm:$0xff] }
 0x134   :  { %3791 = vmatpush3.msra.mxu0 %v6314_v16  ;;  %3781 = vmatprep.subr.mxu1 %v6315_v46  ;;  %v6324_v16 = vand.u32 4294901760, %v5272_v39  ;;  %v6333_v39 = vand.u32 4294901760, %v6300_v44 }
 0x135   :  { %3792 = vmatprep.subr.mxu0 %v6316_v55  ;;  %3782 = vmatpush3.msra.mxu1 %v5478_v60  ;;  %v6337_v55 = vand.u32 4294901760, %v5434_v34  ;;  %v6340_v34 = vand.u32 4294901760, %v5514_v13  ;;  %v6345_v13 = vand.u32 4294901760, %v5551_v50  ;;  %v6353_v50 = vld [vmem:[#allocation23_spill] sm:$0xff] }
 0x136   :  { %3793 = vmatpush3.msra.mxu0 %v6317_v43  ;;  %3783 = vmatprep.subr.mxu1 %v5500_v20  ;;  %v145_v43 = vld [vmem:[#allocation5 + $0x308] sm:$0xff] }
 0x137   :  { %3794 = vmatprep.subr.mxu0 %v6318_v51  ;;  %3784 = vmatpush3.msra.mxu1 %v5510_v19  ;;  %v5747_v32 = vand.u32 4294901760, %v145_v43 }
 0x138   :  { %3795 = vmatpush3.msra.mxu0 %v6319_v41  ;;  %3785 = vmatprep.subr.mxu1 %v5528_v47 }
 0x139   :  { %3796 = vmatprep.subr.mxu0 %v6320_v23  ;;  %3786 = vmatpush3.msra.mxu1 %v5530_v56 }
 0x13a   :  { %2462 = vmatprep.mubr.f32.mxu1 %v6321_v2  ;;  %3797 = vmatpush3.msra.mxu0 %v6322_v11 }
 0x13b   :  { %2466 = vmatmul.mubr.f32.vlgmr.msra.gmra.mxu1 %v6323_v12  ;;  %3798 = vmatprep.subr.mxu0 %v6324_v16 }
 0x13c   :  { %3825 = vmatprep.subr.mxu1 %v5159_v4  ;;  %3799 = vmatpush3.msra.mxu0 %v6325_v49  ;;  %v6329_v4 = vand.u32 4294901760, %v6293_v45  ;;  %v6339_v45 = vand.u32 4294901760, %v5448_v3  ;;  %v6342_v3 = vand.u32 4294901760, %v5534_v25  ;;  %v6347_v25 = vand.u32 4294901760, %v5544_v7 }
 0x13d   :  { %3826 = vmatpush3.msra.mxu1 %v5151_v15  ;;  %3800 = vmatprep.subr.mxu0 %v6326_v18  ;;  %v47_v15 = vld [vmem:[#allocation2 + $0x30] sm:$0xff]  ;;  %v3229_v18 = vld [vmem:[%s5821_s2] ss:$0 sm:$0xff]  ;;  %s4003_s2 = smov [#allocation7]  }
 0x13e   :  { %3827 = vmatprep.subr.mxu1 %v5172_v35  ;;  %3801 = vmatpush3.msra.mxu0 %v6327_v9  ;;  %v6331_v35 = vand.u32 4294901760, %v6297_v59  ;;  %v155_v36 = vsel %vm153_vm0, %v47_v15, 0  ;;  %v6344_v59 = vand.u32 4294901760, %v5521_v1  ;;  %s3219_s24 = sshll.u32 %s4003_s2, 4  ;;  %s3220_s24 = int_to_ptr.vmem [resolvable:$true] %s3219_s24 }
 0x13f   :  { %3828 = vmatpush3.msra.mxu1 %v5164_v28  ;;  %3802 = vmatprep.subr.mxu0 %v6328_v24  ;;  %v6332_v28 = vand.u32 4294901760, %v5412_v57  ;;  %v5736_v57 = vand.u32 4294901760, %v155_v36  ;;  %s3971_s25 = scalar_lea.vmem %s3220_s24, 128  ;;  %p3976_p11 = scmp.lt.s32.totalorder %s3220_s24, %s3220_s24 }
 0x140   :  { %3829 = vmatprep.subr.mxu1 %v6292_v0  ;;  %3803 = vmatpush3.msra.mxu0 %v6329_v4  ;;  %v6338_v0 = vand.u32 4294901760, %v5482_v29  ;;  %v6341_v29 = vand.u32 4294901760, %v5489_v21  ;;  %v6346_v21 = vld [vmem:[#allocation31_spill] sm:$0xff]  ;;  %p3972_p10 = scmp.ne.s32.totalorder %s3220_s24, %s3971_s25  ;;  %p3977_p12 = scmp.lt.s32.totalorder %s3971_s25, %s3971_s25 }
 0x141   :  { %3830 = vmatpush3.msra.mxu1 %v6294_v22  ;;  %3804 = vmatprep.subr.mxu0 %v6330_v33  ;;  %v5753_v63 = vsub.f32 %v155_v36, %v5736_v57  ;;  %v5758_v22 = vand.u32 4294901760, %v144_v30 }
 0x142   :  { %3831 = vmatprep.subr.mxu1 %v6296_v8  ;;  %3805 = vmatpush3.msra.mxu0 %v6331_v35  ;;  %v2850_v8 = vsub.f32 %v145_v43, %v5747_v32  ;;  %p3978_p13 = por %p3977_p12, %p3976_p11 }
 0x143   :  { %3832 = vmatpush3.msra.mxu1 %v6298_v62  ;;  %3806 = vmatprep.subr.mxu0 %v6332_v28  ;;  %v6348_v62 = vld [vmem:[#allocation37_spill] sm:$0xff] }
 0x144   :  { %3833 = vmatprep.subr.mxu1 %v6299_v14  ;;  %3807 = vmatpush3.msra.mxu0 %v6333_v39  ;;  %v6349_v14 = vld [vmem:[#allocation34_spill] sm:$0xff]  ;;  %v2851_v1 = vand.u32 4294901760, %v2850_v8  ;;  %p3979_p0 = pnand %p3978_p13, %p3972_p10 }
 0x145   :  { %3834 = vmatpush3.msra.mxu1 %v6301_v38  ;;  %3808 = vmatprep.subr.mxu0 %v6334_v61  ;;  %v6350_v44 = vand.u32 4294901760, %v6349_v14 }
 0x146   :  { %3835 = vmatprep.subr.mxu1 %v6302_v54  ;;  %3809 = vmatpush3.msra.mxu0 %v6335_v42 }
 0x147   :  { %3836 = vmatpush3.msra.mxu1 %v6303_v48  ;;  %3810 = vmatprep.subr.mxu0 %v6336_v37  ;;  %v6354_v48 = vld [vmem:[#allocation24_spill] sm:$0xff] }
 0x148   :  { %3837 = vmatprep.subr.mxu1 %v6304_v53  ;;  %3811 = vmatpush3.msra.mxu0 %v6337_v55  ;;  %v6355_v53 = vld [vmem:[#allocation39_spill] sm:$0xff] }
 0x149   :  { %3838 = vmatpush3.msra.mxu1 %v6305_v10  ;;  %3812 = vmatprep.subr.mxu0 %v6338_v0  ;;  %v2852_v10 = vsub.f32 %v2850_v8, %v2851_v1 }
 0x14a   :  { %3839 = vmatprep.subr.mxu1 %v6306_v31  ;;  %3813 = vmatpush3.msra.mxu0 %v6339_v45 }
 0x14b   :  { %3840 = vmatpush3.msra.mxu1 %v6307_v17  ;;  %3814 = vmatprep.subr.mxu0 %v6340_v34 }
 0x14c   :  { %3841 = vmatprep.subr.mxu1 %v6308_v58  ;;  %3815 = vmatpush3.msra.mxu0 %v6341_v29  ;;  %v2812_v58 = vand.u32 4294901760, %v5753_v63 }
 0x14d   :  { %3842 = vmatpush3.msra.mxu1 %v6309_v5  ;;  %3816 = vmatprep.subr.mxu0 %v6342_v3  ;;  %v2857_v5 = vsub.f32 %v144_v30, %v5758_v22 }
 0x14e   :  { %3843 = vmatprep.subr.mxu1 %v6343_v27  ;;  %3817 = vmatpush3.msra.mxu0 %v6344_v59  ;;  %v2813_v54 = vsub.f32 %v5753_v63, %v2812_v58 }
 0x14f   :  { %3844 = vmatpush3.msra.mxu1 %v6310_v52  ;;  %3818 = vmatprep.subr.mxu0 %v6345_v13  ;;  %v6351_v52 = vld [vmem:[#allocation35_spill] sm:$0xff]  ;;  %v2858_v7 = vand.u32 4294901760, %v2857_v5 }
 0x150   :  { %3845 = vmatprep.subr.mxu1 %v6346_v21  ;;  %3819 = vmatpush3.msra.mxu0 %v6347_v25  ;;  %v6352_v38 = vand.u32 4294901760, %v6351_v52  ;;  %v2814_v31 = vand.u32 4294901760, %v2813_v54 }
 0x151   :  { %3846 = vmatpush3.msra.mxu1 %v6348_v62  ;;  %3820 = vmatprep.subr.mxu0 %v6350_v44  ;;  %v2859_v17 = vsub.f32 %v2857_v5, %v2858_v7 }
 0x152   :  { %3847 = vmatprep.subr.mxu1 %v5422_v26  ;;  %3821 = vmatpush3.msra.mxu0 %v6352_v38  ;;  %v4001_v26 = vmov 0.0  }
 0x153   :  { %2632 = vmatprep.mubr.f32.mxu0 %v6353_v50  ;;  %3848 = vmatpush3.msra.mxu1 %v6354_v48 }
 0x154   :  { %2634 = vmatmul.mubr.f32.vlgmr.msra.gmra.mxu0 %v6355_v53  ;;  %3849 = vmatprep.subr.mxu1 %v5469_v40  ;;  %v2860_v40 = vand.u32 4294901760, %v2859_v17 }
 0x155   :  { %2736 = vmatprep.mubr.f32.mxu1 %v6353_v50  ;;  %3850 = vmatpush3.msra.mxu1 %v5450_v6  ;;  %v2853_v6 = vand.u32 4294901760, %v2852_v10 }
 0x156   :  { %3878 = vmatprep.subr.mxu0 %v4001_v26  ;;  %3851 = vmatprep.subr.mxu1 %v6315_v46 }
 0x157   :  { %3879 = vmatpush3.msra.mxu0 %v5747_v32  ;;  %3852 = vmatpush3.msra.mxu1 %v5478_v60  ;;  %v3262_v60 = vpop.f32.mrf.mxu0 }
 0x158   :  { %3880 = vmatprep.subr.mxu0 %v4001_v26  ;;  %3853 = vmatprep.subr.mxu1 %v5500_v20 }
 0x159   :  { %3881 = vmatpush3.msra.mxu0 %v5758_v22  ;;  %3854 = vmatpush3.msra.mxu1 %v5510_v19  ;;  %v3263_v20 = vpop.f32.mrf.mxu0  ;;  %v3297_v19 = vpop.f32.mrf.mxu1 }
 0x15a   :  { %3882 = vmatprep.mubr.msk.f32.mxu0 %vm4002_vm1, %v4001_v26  ;;  %3855 = vmatprep.subr.mxu1 %v5528_v47  ;;  %v3264_v49 = vadd.f32 %v3263_v20, %v3262_v60 }
 0x15b   :  { %3883 = vmatmul.mubr.f32.vlgmr.msra.gmra.mxu0 %v2814_v31  ;;  %3856 = vmatpush3.msra.mxu1 %v5530_v56  ;;  %v3332_v56 = vpop.f32.mrf.mxu0  ;;  %v3298_v47 = vpop.f32.mrf.mxu1 }
 0x15c   :  { %3892 = vmatprep.subr.mxu0 %v4001_v26  ;;  %2738 = vmatmul.mubr.f32.vlgmr.msra.gmra.mxu1 %v6355_v53  ;;  %v266_v15 = vadd.f32 %v3264_v49, %v3229_v18  ;;  %v3299_v33 = vadd.f32 %v3298_v47, %v3297_v19 }
 0x15d   :  { %3885 = vmatprep.subr.mxu1 %v4001_v26  ;;  %3889 = vmatprep.mubr.msk.f32.mxu1 %vm4002_vm1, %v4001_v26  ;;  %v3333_v46 = vpop.f32.mrf.mxu0  ;;  %v3367_v51 = vpop.f32.mrf.mxu1 }
 0x15e   :  { %3886 = vmatpush3.msra.mxu1 %v2853_v6  ;;  %3893 = vmatpush3.msra.mxu0 %v2850_v8  ;;  %v3334_v28 = vadd.f32 %v3333_v46, %v3332_v56  ;;  %v498_v61 = vadd.f32 %v3299_v33, %v266_v15 }
 0x15f   :  { %3887 = vmatprep.subr.mxu1 %v4001_v26  ;;  %3894 = vmatprep.subr.mxu0 %v4001_v26  ;;  %v3402_v41 = vpop.f32.mrf.mxu0  ;;  %v3368_v23 = vpop.f32.mrf.mxu1 }
 0x160   :  { %3888 = vmatpush3.msra.mxu1 %v2860_v40  ;;  %3895 = vmatpush3.msra.mxu0 %v2857_v5  ;;  %v3369_v42 = vadd.f32 %v3368_v23, %v3367_v51 }
 0x161   :  { %3890 = vmatmul.mubr.f32.vlgmr.msra.gmra.mxu1 %v5736_v57  ;;  %3899 = vmatprep.subr.mxu1 %v4001_v26  ;;  %v3403_v2 = vpop.f32.mrf.mxu0  ;;  %v3437_v11 = vpop.f32.mrf.mxu1 }
 0x162   :  { %3896 = vmatprep.mubr.msk.f32.mxu0 %vm4002_vm1, %v4001_v26  ;;  %3900 = vmatpush3.msra.mxu1 %v5747_v32  ;;  %v3404_v37 = vadd.f32 %v3403_v2, %v3402_v41 }
 0x163   :  { %3897 = vmatmul.mubr.f32.vlgmr.msra.gmra.mxu0 %v5753_v63  ;;  %3901 = vmatprep.subr.mxu1 %v4001_v26  ;;  %v3438_v16 = vpop.f32.mrf.mxu1 }
 0x164   :  { %3906 = vmatprep.subr.mxu0 %v4001_v26  ;;  %3902 = vmatpush3.msra.mxu1 %v5758_v22  ;;  %v3439_v0 = vadd.f32 %v3438_v16, %v3437_v11 }
 0x165   :  { %3903 = vmatprep.mubr.msk.f32.mxu1 %vm4002_vm1, %v4001_v26  ;;  %3907 = vmatpush3.msra.mxu0 %v2851_v1 }
 0x166   :  { %3904 = vmatmul.mubr.f32.vlgmr.msra.gmra.mxu1 %v2812_v58  ;;  %3908 = vmatprep.subr.mxu0 %v4001_v26 }
 0x167   :  { %3913 = vmatprep.subr.mxu1 %v4001_v26  ;;  %3909 = vmatpush3.msra.mxu0 %v2858_v7 }
 0x168   :  { %3910 = vmatprep.mubr.msk.f32.mxu0 %vm4002_vm1, %v4001_v26  ;;  %3914 = vmatpush3.msra.mxu1 %v5747_v32 }
 0x169   :  { %3911 = vmatmul.mubr.f32.vlgmr.msra.gmra.mxu0 %v5736_v57  ;;  %3915 = vmatprep.subr.mxu1 %v4001_v26  ;;  %v3472_v12 = vpop.f32.mrf.mxu0 }
 0x16a   :  { %3917 = vmatprep.mubr.msk.f32.mxu1 %vm4002_vm1, %v4001_v26  ;;  %3916 = vmatpush3.msra.mxu1 %v5758_v22 }
 0x16b   :  { %3918 = vmatmul.mubr.f32.vlgmr.msra.gmra.mxu1 %v5736_v57  ;;  %v3473_v9 = vpop.f32.mrf.mxu0  ;;  %v636_v57 = vadd.f32 %v3334_v28, %v498_v61 }
 0x16c   :  { %v3474_v34 = vadd.f32 %v3473_v9, %v3472_v12 }
 0x16d   :  { %v744_v30 = vadd.f32 %v3369_v42, %v636_v57 }
 0x16f   :  { %v912_v63 = vadd.f32 %v3404_v37, %v744_v30 }
 0x171   :  { %v1016_v29 = vadd.f32 %v3439_v0, %v912_v63 }
 0x172   :  { %v3507_v24 = vpop.f32.mrf.mxu1 }
 0x173   :  { %v1128_v8 = vadd.f32 %v3474_v34, %v1016_v29 }
 0x174   :  { %v3508_v35 = vpop.f32.mrf.mxu1 }
 0x175   :  { %v3509_v3 = vadd.f32 %v3508_v35, %v3507_v24 }
 0x177   :  { %v1360_v21 = vadd.f32 %v3509_v3, %v1128_v8 }
 0x18b   :  { %v3542_v4 = vpop.f32.mrf.mxu0 }
 0x18d   :  { %v3543_v36 = vpop.f32.mrf.mxu0 }
 0x18e   :  { %v3544_v59 = vadd.f32 %v3543_v36, %v3542_v4 }
 0x190   :  { %v1498_v62 = vadd.f32 %v3544_v59, %v1360_v21 }
 0x194   :  { %v3577_v39 = vpop.f32.mrf.mxu1 }
 0x196   :  { %v3578_v55 = vpop.f32.mrf.mxu1 }
 0x197   :  { %v3579_v5 = vadd.f32 %v3578_v55, %v3577_v39 }
 0x199   :  { %v1606_v1 = vadd.f32 %v3579_v5, %v1498_v62 }
 0x1ad   :  { %v3612_v43 = vpop.f32.mrf.mxu0 }
 0x1af   :  { %v3613_v32 = vpop.f32.mrf.mxu0 }
 0x1b0   :  { %v3614_v14 = vadd.f32 %v3613_v32, %v3612_v43 }
 0x1b2   :  { %v1774_v54 = vadd.f32 %v3614_v14, %v1606_v1 }
 0x1b6   :  { %v3647_v45 = vpop.f32.mrf.mxu1 }
 0x1b8   :  { %v3648_v27 = vpop.f32.mrf.mxu1 }
 0x1b9   :  { %v3649_v52 = vadd.f32 %v3648_v27, %v3647_v45 }
 0x1bb   :  { %v1878_v7 = vadd.f32 %v3649_v52, %v1774_v54 }
 0x1d0   :  { %v3682_v22 = vpop.f32.mrf.mxu0 }
 0x1d2   :  { %v3683_v58 = vpop.f32.mrf.mxu0 }
 0x1d3   :  { %v3684_v48 = vadd.f32 %v3683_v58, %v3682_v22 }
 0x1d5   :  { %v1990_v31 = vadd.f32 %v3684_v48, %v1878_v7 }
 0x1d9   :  { %v3717_v13 = vpop.f32.mrf.mxu1 }
 0x1db   :  { %v3718_v44 = vpop.f32.mrf.mxu1 }
 0x1dc   :  { %v3719_v26 = vadd.f32 %v3718_v44, %v3717_v13 }
 0x1de   :  { %v2222_v40 = vadd.f32 %v3719_v26, %v1990_v31 }
 0x1f2   :  { %v3752_v25 = vpop.f32.mrf.mxu0 }
 0x1f4   :  { %v3753_v38 = vpop.f32.mrf.mxu0 }
 0x1f5   :  { %v3754_v17 = vadd.f32 %v3753_v38, %v3752_v25 }
 0x1f7   :  { %v2360_v19 = vadd.f32 %v3754_v17, %v2222_v40 }
 0x1fb   :  { %v3787_v50 = vpop.f32.mrf.mxu1 }
 0x1fd   :  { %v3788_v10 = vpop.f32.mrf.mxu1 }
 0x1fe   :  { %v3789_v60 = vadd.f32 %v3788_v10, %v3787_v50 }
 0x200   :  { %v2468_v51 = vadd.f32 %v3789_v60, %v2360_v19 }
 0x214   :  { %v3822_v53 = vpop.f32.mrf.mxu0 }
 0x216   :  { %v3823_v6 = vpop.f32.mrf.mxu0 }
 0x217   :  { %v3824_v56 = vadd.f32 %v3823_v6, %v3822_v53 }
 0x219   :  { %v2636_v23 = vadd.f32 %v3824_v56, %v2468_v51 }
 0x21b   :  { %v2816_v20 = vpop.f32.mrf.mxu0 }
 0x21c   :  { %v3857_v47 = vpop.f32.mrf.mxu1 }
 0x21d   :  { %v3884_v46 = vpop.f32.mrf.mxu0 }
 0x21e   :  { %v3858_v41 = vpop.f32.mrf.mxu1 }
 0x21f   :  { %v3859_v2 = vadd.f32 %v3858_v41, %v3857_v47 }
 0x221   :  { %v2897_v11 = vpop.f32.mrf.mxu1  ;;  %v2740_v12 = vadd.f32 %v3859_v2, %v2636_v23 }
 0x223   :  { %v3891_v16 = vpop.f32.mrf.mxu1  ;;  %v2973_v49 = vpop.f32.mrf.mxu0  ;;  %v2817_v18 = vadd.f32 %v2816_v20, %v2740_v12 }
 0x225   :  { %v3898_v9 = vpop.f32.mrf.mxu0  ;;  %v2898_v24 = vadd.f32 %v2897_v11, %v2817_v18 }
 0x226   :  { %v3048_v4 = vpop.f32.mrf.mxu1 }
 0x227   :  { %v2974_v15 = vadd.f32 %v2973_v49, %v2898_v24 }
 0x228   :  { %v3905_v33 = vpop.f32.mrf.mxu1 }
 0x229   :  { %v3125_v35 = vpop.f32.mrf.mxu0  ;;  %v3049_v28 = vadd.f32 %v3048_v4, %v2974_v15 }
 0x22b   :  { %v3912_v36 = vpop.f32.mrf.mxu0  ;;  %v3126_v39 = vadd.f32 %v3125_v35, %v3049_v28  ;;  %v3198_v61 = vpop.f32.mrf.mxu1 }
 0x22d   :  { %v3199_v42 = vadd.f32 %v3198_v61, %v3126_v39  ;;  %v3919_v43 = vpop.f32.mrf.mxu1 }
 0x22f   :  { %3202 = vmax.xlane.f32.xlu0 %v3199_v42 }
 0x2b8   :  { %v3203_v57 = vpop.xlane.xlu0 %3202 }
 0x2b9   :  { %v3204_v37 = vsub.f32 %v3199_v42, %v3203_v57 }
 0x2bb   :  { %v3205_v55 = vmul.f32 1.442695, %v3204_v37 }
 0x2bd   :  { %3927 = vpow2.f32 %v3205_v55 }
 0x2ca   :  { %v3928_v30 = vpop.eup %3927 }
 0x2cb   :  { %3207 = vadd.xlane.f32.xlu0 %v3928_v30 }
 0x354   :  { %v3208_v0 = vpop.xlane.xlu0 %3207 }
 0x355   :  { %3929 = vlog2.f32 %v3208_v0 }
 0x362   :  { %v3930_v32 = vpop.eup %3929 }
 0x363   :  { %v3210_v45 = vmul.f32 0.6931472, %v3930_v32 }
 0x365   :  { %v3211_v63 = vsub.f32 %v3204_v37, %v3210_v45 }
 0x367   :  { %3212 = vst [vmem:[#allocation7] sm:$0xff] %v3211_v63 }
 0x368   :  { %3982 = shalt.err (!%p3979_p0)
}
 0x369   :  { %3222 = dma.vmem_to_hbm [thread:$0]  %s3220_s24, 128, %s5822_s3, [#allocation4]  }
 0x36a   :  { %3995 = dma.done.wait [#allocation4], 128  }
 0x36b   :  { %3996 = vsyncadd [#allocation4], 4294967168 }
 0x36c   :  { %3226 = vsyncpa [#allocation3], 1 }
 0x36d   :  { %3227 = vsyncpa [#allocation6], 1 }
 0x36e   :  { %3228 = vsyncpa [#allocation4], 1 }

</bundles_post_ra>
